<compile_context>
chip_gen: v7x
topology: tpu7x:2x2x1
jax: 0.10.0
libtpu: 0.0.40
codegen_flags: <defaults>
</compile_context>

<pallas_src>
import functools

import jax
import jax.numpy as jnp
from jax.experimental import pallas as pl
from jax.experimental.pallas import tpu as pltpu


_FP = 128   # lane-padded feature width (in=16, hidden=32, classes=8 all fit)


# ---------------------------------------------------------------------------
# Fused Pallas kernel: all SAGE layers + linear + softmax in one call
# ---------------------------------------------------------------------------
def _fused_encoder_kernel(a_hbm, x_hbm, dinv_ref, w_ref, b_ref, lw_ref, lb_ref,
                          o_hbm, a_scr, h_scr, o_stage, sems,
                          *, num_layers, tm, n_pad, out_channels, row_tiles):
    l = pl.program_id(0)        # conv-layer index (outermost, strictly sequential)
    i = pl.program_id(1)        # destination-row tile index

    # One-time prologue: kick off the X copy and ALL A row-block copies, but only
    # wait for X here; each layer-0 row tile waits on just its own A chunk so the
    # HBM->VMEM fill overlaps with layer-0 MXU work.
    @pl.when((l == 0) & (i == 0))
    def _prologue():
        pltpu.make_async_copy(x_hbm, h_scr.at[pl.ds(0, n_pad), :],
                              sems.at[row_tiles]).start()
        for t in range(row_tiles):
            pltpu.make_async_copy(a_hbm.at[pl.ds(t * tm, tm), :],
                                  a_scr.at[pl.ds(t * tm, tm), :],
                                  sems.at[t]).start()
        pltpu.make_async_copy(x_hbm, h_scr.at[pl.ds(0, n_pad), :],
                              sems.at[row_tiles]).wait()

    @pl.when(l == 0)
    def _wait_a_tile():
        pltpu.make_async_copy(a_hbm.at[pl.ds(i * tm, tm), :],
                              a_scr.at[pl.ds(i * tm, tm), :],
                              sems.at[i]).wait()

    # Ping-pong feature scratch: layer l reads half p_in, writes half 1-p_in.
    p_in = l % 2
    base_in = pl.multiple_of(p_in * n_pad, tm)
    base_out = pl.multiple_of((1 - p_in) * n_pad, tm)
    row = pl.multiple_of(i * tm, tm)

    # Mean aggregation: (tm, n_pad) @ (n_pad, fp) edge-count matmul, then an
    # exact f32 per-destination-row 1/deg rescale (removes bf16(1/deg) rounding).
    a_tile = a_scr[pl.ds(row, tm), :]
    h_all = h_scr[pl.ds(base_in, n_pad), :]
    agg = jnp.dot(a_tile, h_all, preferred_element_type=jnp.float32)
    agg = agg * dinv_ref[...]
    h_i = h_scr[pl.ds(pl.multiple_of(base_in + row, tm), tm), :]

    # Two accumulated dots (no concat scratch): z = agg @ W_l + h_i @ W_r + b.
    z = (jnp.dot(agg.astype(jnp.bfloat16), w_ref[0, 0, :, :],
                 preferred_element_type=jnp.float32)
         + jnp.dot(h_i, w_ref[0, 1, :, :], preferred_element_type=jnp.float32)
         + b_ref[0])

    @pl.when(l < num_layers - 1)
    def _hidden_layer():
        # relu, keep the activation resident in VMEM for the next layer
        h_scr[pl.ds(pl.multiple_of(base_out + row, tm), tm), :] = (
            jnp.maximum(z, 0.0).astype(h_scr.dtype))

    @pl.when(l == num_layers - 1)
    def _last_layer():
        # tanh -> linear -> masked softmax (exact division), then write this
        # tile to HBM via a manual DMA (no per-layer output writeback).
        t = jnp.tanh(z).astype(jnp.bfloat16)
        logits = (jnp.dot(t, lw_ref[...], preferred_element_type=jnp.float32)
                  + lb_ref[...])
        lane = jax.lax.broadcasted_iota(jnp.int32, logits.shape, 1)
        logits = jnp.where(lane < out_channels, logits, -1e30)
        m = jnp.max(logits, axis=-1, keepdims=True)
        e = jnp.exp(logits - m)
        s = jnp.sum(e, axis=-1, keepdims=True)
        o_stage[...] = e / s
        cp = pltpu.make_async_copy(o_stage, o_hbm.at[pl.ds(row, tm), :],
                                   sems.at[row_tiles + 1])
        cp.start()
        cp.wait()


# ---------------------------------------------------------------------------
# Wrapper: padding / packing + pallas_call
# ---------------------------------------------------------------------------
def _round_up(v, m):
    return (v + m - 1) // m * m


def _pad2(arr, rows, cols):
    return jnp.pad(arr, ((0, rows - arr.shape[0]), (0, cols - arr.shape[1])))


def _pick_tiling(n):
    """Decouple padding from a fixed 256-row tile for small graphs."""
    n128 = _round_up(max(n, 1), 128)
    tm = min(256, n128)
    return tm, _round_up(n, tm)


def _vmem_limit_bytes():
    """Generation-aware VMEM budget (v5e/v6e: 128 MiB, v7x: 64 MiB physical)."""
    try:
        cap = int(pltpu.get_tpu_info().vmem_capacity_bytes)
    except Exception:
        cap = 64 * 1024 * 1024
    return (cap * 3) // 4


def encoder_forward(params, x, a_counts, deg_inv):
    """Encoder.forward(x, edge_index) with dropout p=0.0, as one fused kernel."""
    n = x.shape[0]
    out_channels = params["lin_w"].shape[1]
    num_layers = len(params["convs"])
    tm, n_pad = _pick_tiling(n)
    row_tiles = n_pad // tm
    cpad = _FP                                   # lane-dense padded class width

    vmem_limit = _vmem_limit_bytes()
    need = (n_pad * n_pad * 2                    # resident A scratch (bf16 counts)
            + 2 * n_pad * _FP * 2                # ping-pong feature scratch (bf16)
            + tm * cpad * 4                      # output staging tile (f32)
            + 6 * 1024 * 1024)                   # weight/bias/deg blocks + slack
    if need > vmem_limit:
        # TODO(synk): for larger graphs, stream A in (TM, TK) tiles with a
        # K-accumulation grid axis (or go sparse: CSR scalar-prefetch + DMA
        # gather); on v7x also consider an fp8 count matrix and dual-TC row
        # sharding via core_map instead of the resident-A design.
        raise NotImplementedError("graph too large for the resident-A fused kernel")

    # Pack operands: bf16 matmul operands (f32 accumulation in-kernel), f32 biases.
    # a_counts holds small integer edge counts -> exact in bf16.
    a_pad = _pad2(a_counts, n_pad, n_pad).astype(jnp.bfloat16)
    x_pad = _pad2(x, n_pad, _FP).astype(jnp.bfloat16)
    dinv_pad = _pad2(deg_inv, n_pad, 1).astype(jnp.float32)
    w_stack = jnp.stack([
        jnp.stack([_pad2(layer["w_l"], _FP, _FP),
                   _pad2(layer["w_r"], _FP, _FP)], axis=0)
        for layer in params["convs"]]).astype(jnp.bfloat16)            # (L,2,FP,FP)
    b_stack = jnp.stack([_pad2(layer["b"], 1, _FP)
                         for layer in params["convs"]]).astype(jnp.float32)  # (L,1,FP)
    lin_w = _pad2(params["lin_w"], _FP, cpad).astype(jnp.bfloat16)
    lin_b = _pad2(params["lin_b"], 1, cpad).astype(jnp.float32)

    kern = functools.partial(_fused_encoder_kernel, num_layers=num_layers,
                             tm=tm, n_pad=n_pad, out_channels=out_channels,
                             row_tiles=row_tiles)

    out_pad = pl.pallas_call(
        kern,
        out_shape=jax.ShapeDtypeStruct((n_pad, cpad), jnp.float32),
        grid_spec=pltpu.PrefetchScalarGridSpec(
            num_scalar_prefetch=0,
            grid=(num_layers, row_tiles),
            in_specs=[
                pl.BlockSpec(memory_space=pl.ANY),                     # A counts (HBM)
                pl.BlockSpec(memory_space=pl.ANY),                     # X (HBM)
                pl.BlockSpec((tm, 1), lambda l, i: (i, 0)),            # 1/in-degree
                pl.BlockSpec((1, 2, _FP, _FP), lambda l, i: (l, 0, 0, 0)),  # W_l/W_r
                pl.BlockSpec((1, 1, _FP), lambda l, i: (l, 0, 0)),          # bias
                pl.BlockSpec((_FP, cpad), lambda l, i: (0, 0)),             # lin_w
                pl.BlockSpec((1, cpad), lambda l, i: (0, 0)),               # lin_b
            ],
            # Output lives in HBM and is written by a manual DMA only on the last
            # layer -> no (L-1) wasted writebacks of uninitialized tiles.
            out_specs=pl.BlockSpec(memory_space=pl.ANY),
            scratch_shapes=[
                pltpu.VMEM((n_pad, n_pad), jnp.bfloat16),      # resident adjacency
                pltpu.VMEM((2 * n_pad, _FP), jnp.bfloat16),    # ping-pong features
                pltpu.VMEM((tm, cpad), jnp.float32),           # output staging tile
                pltpu.SemaphoreType.DMA((row_tiles + 2,)),     # A chunks + X + out
            ],
        ),
        compiler_params=pltpu.CompilerParams(
            # layer axis is sequential; row axis reads the whole previous-layer
            # scratch, so it must stay on one core as well.
            # TODO(synk): on v7x, shard row tiles across both TensorCores with a
            # per-layer core_barrier for large graphs.
            dimension_semantics=("arbitrary", "arbitrary"),
            vmem_limit_bytes=vmem_limit,
        ),
    )(a_pad, x_pad, dinv_pad, w_stack, b_stack, lin_w, lin_b)

    return out_pad[:n, :out_channels]


# ---------------------------------------------------------------------------
# Glue: per-graph setup (hoisted out of the forward), parameter init, and a
# pure-JAX reference matched to the kernel's bf16-operand / f32-accum math.
# ---------------------------------------------------------------------------
def graph_operands(edge_index, num_nodes):
    """Edge-count matrix C[i, j] = #edges j->i plus 1/in-degree per dest row."""
    src, dst = edge_index[0], edge_index[1]
    counts = jnp.zeros((num_nodes, num_nodes), jnp.float32).at[dst, src].add(1.0)
    deg = jnp.sum(counts, axis=1, keepdims=True)
    deg_inv = 1.0 / jnp.where(deg == 0.0, 1.0, deg)
    return counts, deg_inv


def glorot(key, fan_in, fan_out):
    lim = jnp.sqrt(6.0 / (fan_in + fan_out))
    return jax.random.uniform(key, (fan_in, fan_out), jnp.float32, -lim, lim)


def init_encoder_params(key, in_channels, hidden, out_channels, num_layers):
    params = {"convs": []}
    dims = [in_channels] + [hidden] * num_layers
    for i in range(num_layers):
        key, k1, k2 = jax.random.split(key, 3)
        params["convs"].append({
            "w_l": glorot(k1, dims[i], dims[i + 1]),        # neighbor (lin_l)
            "w_r": glorot(k2, dims[i], dims[i + 1]),        # root     (lin_r)
            "b": jnp.zeros((1, dims[i + 1]), jnp.float32),  # lin_l bias
        })
    key, k1 = jax.random.split(key)
    params["lin_w"] = glorot(k1, hidden, out_channels)
    params["lin_b"] = jnp.zeros((1, out_channels), jnp.float32)
    return params


def encoder_reference(params, x, a_counts, deg_inv):
    """Pure-JAX reference mirroring the kernel's bf16-operand / f32-accum math."""
    bf, f32 = jnp.bfloat16, jnp.float32
    ab = a_counts.astype(bf)
    h = x.astype(bf)
    num_layers = len(params["convs"])
    for idx, layer in enumerate(params["convs"]):
        agg = jnp.dot(ab, h, preferred_element_type=f32) * deg_inv
        z = (jnp.dot(agg.astype(bf), layer["w_l"].astype(bf),
                     preferred_element_type=f32)
             + jnp.dot(h, layer["w_r"].astype(bf), preferred_element_type=f32)
             + layer["b"])
        h = (jnp.maximum(z, 0.0) if idx < num_layers - 1 else jnp.tanh(z)).astype(bf)
    logits = (jnp.dot(h, params["lin_w"].astype(bf), preferred_element_type=f32)
              + params["lin_b"])
    return jax.nn.softmax(logits, axis=-1)


# ---------------------------------------------------------------------------
if __name__ == "__main__":
    key = jax.random.PRNGKey(0)

    num_nodes = 64
    num_edges = 256
    in_channels = 16
    hidden = 32
    out_channels = 8
    max_depth = 2

    key, kx, ks, kd, kp = jax.random.split(key, 5)
    x = jax.random.normal(kx, (num_nodes, in_channels), jnp.float32)
    src = jax.random.randint(ks, (num_edges,), 0, num_nodes, jnp.int32)
    dst = jax.random.randint(kd, (num_edges,), 0, num_nodes, jnp.int32)
    edge_index = jnp.stack([src, dst], axis=0)

    params = init_encoder_params(kp, in_channels, hidden, out_channels, max_depth)

    # Adjacency build is pure per-graph setup: do it once, outside the forward.
    a_counts, deg_inv = graph_operands(edge_index, num_nodes)

    out = jax.block_until_ready(encoder_forward(params, x, a_counts, deg_inv))
    ref = jax.block_until_ready(encoder_reference(params, x, a_counts, deg_inv))

    assert out.shape == (num_nodes, out_channels)
    assert bool(jnp.all(jnp.isfinite(out)))
    # exact-division softmax: rows sum to one tightly
    assert bool(jnp.allclose(jnp.sum(out, axis=-1), 1.0, atol=1e-3))
    max_err = float(jnp.max(jnp.abs(out - ref)))
    assert max_err < 2e-2, f"max |kernel - reference| = {max_err}"
    print("KERNEL_OK")
</pallas_src>

<mosaic_0001>
module attributes {stable_mosaic.version = 11 : i64} {
  func.func @_fused_encoder_kernel(%arg0: i32, %arg1: i32, %arg2: memref<128x128xbf16, #tpu.memory_space<any>>, %arg3: memref<128x128xbf16, #tpu.memory_space<any>>, %arg4: memref<128x1xf32, #tpu.memory_space<vmem>>, %arg5: memref<1x2x128x128xbf16, #tpu.memory_space<vmem>>, %arg6: memref<1x1x128xf32, #tpu.memory_space<vmem>>, %arg7: memref<128x128xbf16, #tpu.memory_space<vmem>>, %arg8: memref<1x128xf32, #tpu.memory_space<vmem>>, %arg9: memref<128x128xf32, #tpu.memory_space<any>>, %arg10: memref<128x128xbf16, #tpu.memory_space<vmem>>, %arg11: memref<256x128xbf16, #tpu.memory_space<vmem>>, %arg12: memref<128x128xf32, #tpu.memory_space<vmem>>, %arg13: memref<3x!tpu.dma_semaphore, #tpu.memory_space<semaphore_mem>>) attributes {dimension_semantics = [#tpu.dimension_semantics<arbitrary>, #tpu.dimension_semantics<arbitrary>], iteration_bounds = array<i64: 2, 1>, scalar_prefetch = 0 : i64, scratch_operands = 4 : i64, tpu.core_type = #tpu.core_type<tc>, window_params = [{}, {}, {transform_indices = @transform_2, window_bounds = array<i64: 128, 1>}, {transform_indices = @transform_3, window_bounds = array<i64: 1, 2, 128, 128>}, {transform_indices = @transform_4, window_bounds = array<i64: 1, 1, 128>}, {pipeline_mode = #tpu.pipeline_mode<synchronous>, transform_indices = @transform_5, window_bounds = array<i64: 128, 128>}, {pipeline_mode = #tpu.pipeline_mode<synchronous>, transform_indices = @transform_6, window_bounds = array<i64: 1, 128>}, {}]} {
    %c0_i32 = arith.constant 0 : i32
    %0 = arith.cmpi eq, %arg0, %c0_i32 : i32
    %c0_i32_0 = arith.constant 0 : i32
    %1 = arith.cmpi eq, %arg1, %c0_i32_0 : i32
    %2 = arith.andi %0, %1 : i1
    %3 = arith.extui %2 : i1 to i32
    %c0_i32_1 = arith.constant 0 : i32
    %4 = arith.cmpi ne, %3, %c0_i32_1 : i32
    scf.if %4 {
      %c1_i32_31 = arith.constant 1 : i32
      %c0_i32_32 = arith.constant 0 : i32
      %c0_i32_33 = arith.constant 0 : i32
      %55 = tpu.memref_slice %arg11[%c0_i32_32, %c0_i32_33] : memref<256x128xbf16, #tpu.memory_space<vmem>> -> memref<128x128xbf16, #tpu.memory_space<vmem>>
      %56 = tpu.memref_slice %arg13[%c1_i32_31] : memref<3x!tpu.dma_semaphore, #tpu.memory_space<semaphore_mem>> -> memref<1x!tpu.dma_semaphore, #tpu.memory_space<semaphore_mem>>
      %57 = tpu.memref_squeeze %56 : memref<1x!tpu.dma_semaphore, #tpu.memory_space<semaphore_mem>> -> memref<!tpu.dma_semaphore, #tpu.memory_space<semaphore_mem>>
      tpu.enqueue_dma source(%arg3 : memref<128x128xbf16, #tpu.memory_space<any>>) target(%55 : memref<128x128xbf16, #tpu.memory_space<vmem>>) target_semaphore(%57 : memref<!tpu.dma_semaphore, #tpu.memory_space<semaphore_mem>>)
      %c0_i32_34 = arith.constant 0 : i32
      %c0_i32_35 = arith.constant 0 : i32
      %c0_i32_36 = arith.constant 0 : i32
      %58 = tpu.memref_slice %arg2[%c0_i32_35, %c0_i32_36] : memref<128x128xbf16, #tpu.memory_space<any>> -> memref<128x128xbf16, #tpu.memory_space<any>>
      %c0_i32_37 = arith.constant 0 : i32
      %c0_i32_38 = arith.constant 0 : i32
      %59 = tpu.memref_slice %arg10[%c0_i32_37, %c0_i32_38] : memref<128x128xbf16, #tpu.memory_space<vmem>> -> memref<128x128xbf16, #tpu.memory_space<vmem>>
      %60 = tpu.memref_slice %arg13[%c0_i32_34] : memref<3x!tpu.dma_semaphore, #tpu.memory_space<semaphore_mem>> -> memref<1x!tpu.dma_semaphore, #tpu.memory_space<semaphore_mem>>
      %61 = tpu.memref_squeeze %60 : memref<1x!tpu.dma_semaphore, #tpu.memory_space<semaphore_mem>> -> memref<!tpu.dma_semaphore, #tpu.memory_space<semaphore_mem>>
      tpu.enqueue_dma source(%58 : memref<128x128xbf16, #tpu.memory_space<any>>) target(%59 : memref<128x128xbf16, #tpu.memory_space<vmem>>) target_semaphore(%61 : memref<!tpu.dma_semaphore, #tpu.memory_space<semaphore_mem>>)
      %c1_i32_39 = arith.constant 1 : i32
      %c0_i32_40 = arith.constant 0 : i32
      %c0_i32_41 = arith.constant 0 : i32
      %62 = tpu.memref_slice %arg11[%c0_i32_40, %c0_i32_41] : memref<256x128xbf16, #tpu.memory_space<vmem>> -> memref<128x128xbf16, #tpu.memory_space<vmem>>
      %63 = tpu.memref_slice %arg13[%c1_i32_39] : memref<3x!tpu.dma_semaphore, #tpu.memory_space<semaphore_mem>> -> memref<1x!tpu.dma_semaphore, #tpu.memory_space<semaphore_mem>>
      %64 = tpu.memref_squeeze %63 : memref<1x!tpu.dma_semaphore, #tpu.memory_space<semaphore_mem>> -> memref<!tpu.dma_semaphore, #tpu.memory_space<semaphore_mem>>
      tpu.wait_dma2 semaphore(%64 : memref<!tpu.dma_semaphore, #tpu.memory_space<semaphore_mem>>) src(%arg3 : memref<128x128xbf16, #tpu.memory_space<any>>) dst(%62 : memref<128x128xbf16, #tpu.memory_space<vmem>>)
    } else {
    }
    %c0_i32_2 = arith.constant 0 : i32
    %5 = arith.cmpi eq, %arg0, %c0_i32_2 : i32
    %6 = arith.extui %5 : i1 to i32
    %c0_i32_3 = arith.constant 0 : i32
    %7 = arith.cmpi ne, %6, %c0_i32_3 : i32
    scf.if %7 {
      %c128_i32_31 = arith.constant 128 : i32
      %55 = arith.muli %arg1, %c128_i32_31 : i32
      %c128_i32_32 = arith.constant 128 : i32
      %56 = arith.muli %arg1, %c128_i32_32 : i32
      %c0_i32_33 = arith.constant 0 : i32
      %57 = tpu.memref_slice %arg2[%55, %c0_i32_33] : memref<128x128xbf16, #tpu.memory_space<any>> -> memref<128x128xbf16, #tpu.memory_space<any>>
      %c0_i32_34 = arith.constant 0 : i32
      %58 = tpu.memref_slice %arg10[%56, %c0_i32_34] : memref<128x128xbf16, #tpu.memory_space<vmem>> -> memref<128x128xbf16, #tpu.memory_space<vmem>>
      %59 = tpu.memref_slice %arg13[%arg1] : memref<3x!tpu.dma_semaphore, #tpu.memory_space<semaphore_mem>> -> memref<1x!tpu.dma_semaphore, #tpu.memory_space<semaphore_mem>>
      %60 = tpu.memref_squeeze %59 : memref<1x!tpu.dma_semaphore, #tpu.memory_space<semaphore_mem>> -> memref<!tpu.dma_semaphore, #tpu.memory_space<semaphore_mem>>
      tpu.wait_dma2 semaphore(%60 : memref<!tpu.dma_semaphore, #tpu.memory_space<semaphore_mem>>) src(%57 : memref<128x128xbf16, #tpu.memory_space<any>>) dst(%58 : memref<128x128xbf16, #tpu.memory_space<vmem>>)
    } else {
    }
    %c2_i32 = arith.constant 2 : i32
    %c0_i32_4 = arith.constant 0 : i32
    %8 = arith.cmpi eq, %c2_i32, %c0_i32_4 : i32
    %c1_i32 = arith.constant 1 : i32
    %9 = arith.select %8, %c1_i32, %c2_i32 : i32
    %10 = arith.remsi %arg0, %9 : i32
    %c0_i32_5 = arith.constant 0 : i32
    %11 = arith.cmpi ne, %10, %c0_i32_5 : i32
    %c0_i32_6 = arith.constant 0 : i32
    %12 = arith.cmpi slt, %10, %c0_i32_6 : i32
    %c0_i32_7 = arith.constant 0 : i32
    %13 = arith.cmpi slt, %9, %c0_i32_7 : i32
    %14 = arith.xori %12, %13 : i1
    %15 = arith.andi %14, %11 : i1
    %16 = arith.addi %10, %9 : i32
    %17 = arith.select %15, %16, %10 : i32
    %c128_i32 = arith.constant 128 : i32
    %18 = arith.muli %17, %c128_i32 : i32
    %19 = tpu.assume_multiple %18, 128 : i32
    %c1_i32_8 = arith.constant 1 : i32
    %20 = arith.subi %c1_i32_8, %17 : i32
    %c128_i32_9 = arith.constant 128 : i32
    %21 = arith.muli %20, %c128_i32_9 : i32
    %22 = tpu.assume_multiple %21, 128 : i32
    %c128_i32_10 = arith.constant 128 : i32
    %23 = arith.muli %arg1, %c128_i32_10 : i32
    %24 = tpu.assume_multiple %23, 128 : i32
    %25 = arith.index_cast %24 : i32 to index
    %c0 = arith.constant 0 : index
    %26 = vector.load %arg10[%25, %c0] : memref<128x128xbf16, #tpu.memory_space<vmem>>, vector<128x128xbf16>
    %27 = arith.index_cast %19 : i32 to index
    %c0_11 = arith.constant 0 : index
    %28 = vector.load %arg11[%27, %c0_11] : memref<256x128xbf16, #tpu.memory_space<vmem>>, vector<128x128xbf16>
    %cst = arith.constant dense<0.000000e+00> : vector<128x128xf32>
    %29 = tpu.matmul %26, %28, %cst {dimension_numbers = #tpu.dot_dimension_numbers<[1], [0], [0], [1], [0, 0, 1, 1], [], []>} : vector<128x128xbf16>, vector<128x128xbf16>, vector<128x128xf32> -> vector<128x128xf32>
    %c0_12 = arith.constant 0 : index
    %c0_13 = arith.constant 0 : index
    %30 = vector.load %arg4[%c0_12, %c0_13] : memref<128x1xf32, #tpu.memory_space<vmem>>, vector<128x1xf32>
    %31 = vector.broadcast %30 : vector<128x1xf32> to vector<128x128xf32>
    %32 = arith.mulf %29, %31 : vector<128x128xf32>
    %33 = arith.addi %19, %24 : i32
    %34 = tpu.assume_multiple %33, 128 : i32
    %35 = arith.index_cast %34 : i32 to index
    %c0_14 = arith.constant 0 : index
    %36 = vector.load %arg11[%35, %c0_14] : memref<256x128xbf16, #tpu.memory_space<vmem>>, vector<128x128xbf16>
    %37 = arith.truncf %32 : vector<128x128xf32> to vector<128x128xbf16>
    %c0_15 = arith.constant 0 : index
    %c0_16 = arith.constant 0 : index
    %c0_17 = arith.constant 0 : index
    %c0_18 = arith.constant 0 : index
    %38 = vector.load %arg5[%c0_15, %c0_16, %c0_17, %c0_18] : memref<1x2x128x128xbf16, #tpu.memory_space<vmem>>, vector<1x1x128x128xbf16>
    %39 = vector.shape_cast %38 : vector<1x1x128x128xbf16> to vector<128x128xbf16>
    %cst_19 = arith.constant dense<0.000000e+00> : vector<128x128xf32>
    %40 = tpu.matmul %37, %39, %cst_19 {dimension_numbers = #tpu.dot_dimension_numbers<[1], [0], [0], [1], [0, 0, 1, 1], [], []>} : vector<128x128xbf16>, vector<128x128xbf16>, vector<128x128xf32> -> vector<128x128xf32>
    %c0_20 = arith.constant 0 : index
    %c1 = arith.constant 1 : index
    %c0_21 = arith.constant 0 : index
    %c0_22 = arith.constant 0 : index
    %41 = vector.load %arg5[%c0_20, %c1, %c0_21, %c0_22] : memref<1x2x128x128xbf16, #tpu.memory_space<vmem>>, vector<1x1x128x128xbf16>
    %42 = vector.shape_cast %41 : vector<1x1x128x128xbf16> to vector<128x128xbf16>
    %cst_23 = arith.constant dense<0.000000e+00> : vector<128x128xf32>
    %43 = tpu.matmul %36, %42, %cst_23 {dimension_numbers = #tpu.dot_dimension_numbers<[1], [0], [0], [1], [0, 0, 1, 1], [], []>} : vector<128x128xbf16>, vector<128x128xbf16>, vector<128x128xf32> -> vector<128x128xf32>
    %44 = arith.addf %40, %43 : vector<128x128xf32>
    %c0_24 = arith.constant 0 : index
    %c0_25 = arith.constant 0 : index
    %c0_26 = arith.constant 0 : index
    %45 = vector.load %arg6[%c0_24, %c0_25, %c0_26] : memref<1x1x128xf32, #tpu.memory_space<vmem>>, vector<1x1x128xf32>
    %46 = vector.shape_cast %45 : vector<1x1x128xf32> to vector<1x128xf32>
    %47 = vector.broadcast %46 : vector<1x128xf32> to vector<128x128xf32>
    %48 = arith.addf %44, %47 : vector<128x128xf32>
    %c1_i32_27 = arith.constant 1 : i32
    %49 = arith.cmpi slt, %arg0, %c1_i32_27 : i32
    %50 = arith.extui %49 : i1 to i32
    %c0_i32_28 = arith.constant 0 : i32
    %51 = arith.cmpi ne, %50, %c0_i32_28 : i32
    scf.if %51 {
      %cst_31 = arith.constant 0.000000e+00 : f32
      %55 = vector.broadcast %cst_31 : f32 to vector<128x128xf32>
      %56 = arith.maximumf %48, %55 : vector<128x128xf32>
      %57 = arith.truncf %56 : vector<128x128xf32> to vector<128x128xbf16>
      %58 = arith.addi %22, %24 : i32
      %59 = tpu.assume_multiple %58, 128 : i32
      %60 = arith.index_cast %59 : i32 to index
      %c0_32 = arith.constant 0 : index
      %61 = vector.load %arg11[%60, %c0_32] : memref<256x128xbf16, #tpu.memory_space<vmem>>, vector<128x128xbf16>
      tpu.vector_store %arg11[%60, %c0_32], %57 {strides = array<i32>} : memref<256x128xbf16, #tpu.memory_space<vmem>>, vector<128x128xbf16>,
    } else {
    }
    %c1_i32_29 = arith.constant 1 : i32
    %52 = arith.cmpi eq, %arg0, %c1_i32_29 : i32
    %53 = arith.extui %52 : i1 to i32
    %c0_i32_30 = arith.constant 0 : i32
    %54 = arith.cmpi ne, %53, %c0_i32_30 : i32
    scf.if %54 {
      %55 = math.tanh %48 : vector<128x128xf32>
      %56 = arith.truncf %55 : vector<128x128xf32> to vector<128x128xbf16>
      %c0_31 = arith.constant 0 : index
      %c0_32 = arith.constant 0 : index
      %57 = vector.load %arg7[%c0_31, %c0_32] : memref<128x128xbf16, #tpu.memory_space<vmem>>, vector<128x128xbf16>
      %cst_33 = arith.constant dense<0.000000e+00> : vector<128x128xf32>
      %58 = tpu.matmul %56, %57, %cst_33 {dimension_numbers = #tpu.dot_dimension_numbers<[1], [0], [0], [1], [0, 0, 1, 1], [], []>} : vector<128x128xbf16>, vector<128x128xbf16>, vector<128x128xf32> -> vector<128x128xf32>
      %c0_34 = arith.constant 0 : index
      %c0_35 = arith.constant 0 : index
      %59 = vector.load %arg8[%c0_34, %c0_35] : memref<1x128xf32, #tpu.memory_space<vmem>>, vector<1x128xf32>
      %60 = vector.broadcast %59 : vector<1x128xf32> to vector<128x128xf32>
      %61 = arith.addf %58, %60 : vector<128x128xf32>
      %62 = tpu.iota {dimensions = array<i32: 1>} : vector<128x128xi32>
      %c8_i32 = arith.constant 8 : i32
      %63 = vector.broadcast %c8_i32 : i32 to vector<128x128xi32>
      %64 = arith.cmpi slt, %62, %63 : vector<128x128xi32>
      %cst_36 = arith.constant -1.000000e+30 : f32
      %65 = vector.broadcast %cst_36 : f32 to vector<128x128xf32>
      %66 = arith.select %64, %61, %65 : vector<128x128xi1>, vector<128x128xf32>
      %cst_37 = arith.constant dense<0xFF800000> : vector<128xf32>
      %67 = vector.multi_reduction <maximumf>, %66, %cst_37 [1] : vector<128x128xf32> to vector<128xf32>
      %68 = vector.shape_cast %67 : vector<128xf32> to vector<128x1xf32>
      %69 = vector.broadcast %68 : vector<128x1xf32> to vector<128x128xf32>
      %70 = arith.subf %66, %69 : vector<128x128xf32>
      %71 = math.exp %70 : vector<128x128xf32>
      %cst_38 = arith.constant dense<0.000000e+00> : vector<128xf32>
      %72 = vector.multi_reduction <add>, %71, %cst_38 [1] : vector<128x128xf32> to vector<128xf32>
      %73 = vector.shape_cast %72 : vector<128xf32> to vector<128x1xf32>
      %74 = vector.broadcast %73 : vector<128x1xf32> to vector<128x128xf32>
      %75 = arith.divf %71, %74 : vector<128x128xf32>
      %c0_39 = arith.constant 0 : index
      %c0_40 = arith.constant 0 : index
      %76 = vector.load %arg12[%c0_39, %c0_40] : memref<128x128xf32, #tpu.memory_space<vmem>>, vector<128x128xf32>
      tpu.vector_store %arg12[%c0_39, %c0_40], %75 {strides = array<i32>} : memref<128x128xf32, #tpu.memory_space<vmem>>, vector<128x128xf32>,
      %c2_i32_41 = arith.constant 2 : i32
      %c0_i32_42 = arith.constant 0 : i32
      %77 = tpu.memref_slice %arg9[%24, %c0_i32_42] : memref<128x128xf32, #tpu.memory_space<any>> -> memref<128x128xf32, #tpu.memory_space<any>>
      %78 = tpu.memref_slice %arg13[%c2_i32_41] : memref<3x!tpu.dma_semaphore, #tpu.memory_space<semaphore_mem>> -> memref<1x!tpu.dma_semaphore, #tpu.memory_space<semaphore_mem>>
      %79 = tpu.memref_squeeze %78 : memref<1x!tpu.dma_semaphore, #tpu.memory_space<semaphore_mem>> -> memref<!tpu.dma_semaphore, #tpu.memory_space<semaphore_mem>>
      tpu.enqueue_dma source(%arg12 : memref<128x128xf32, #tpu.memory_space<vmem>>) target(%77 : memref<128x128xf32, #tpu.memory_space<any>>) target_semaphore(%79 : memref<!tpu.dma_semaphore, #tpu.memory_space<semaphore_mem>>)
      %c2_i32_43 = arith.constant 2 : i32
      %c0_i32_44 = arith.constant 0 : i32
      %80 = tpu.memref_slice %arg9[%24, %c0_i32_44] : memref<128x128xf32, #tpu.memory_space<any>> -> memref<128x128xf32, #tpu.memory_space<any>>
      %81 = tpu.memref_slice %arg13[%c2_i32_43] : memref<3x!tpu.dma_semaphore, #tpu.memory_space<semaphore_mem>> -> memref<1x!tpu.dma_semaphore, #tpu.memory_space<semaphore_mem>>
      %82 = tpu.memref_squeeze %81 : memref<1x!tpu.dma_semaphore, #tpu.memory_space<semaphore_mem>> -> memref<!tpu.dma_semaphore, #tpu.memory_space<semaphore_mem>>
      tpu.wait_dma2 semaphore(%82 : memref<!tpu.dma_semaphore, #tpu.memory_space<semaphore_mem>>) src(%arg12 : memref<128x128xf32, #tpu.memory_space<vmem>>) dst(%80 : memref<128x128xf32, #tpu.memory_space<any>>)
    } else {
    }
    return
  }
  func.func @transform_2(%arg0: i32, %arg1: i32) -> (i32, i32) {
    %c0_i32 = arith.constant 0 : i32
    %c0_i32_0 = arith.constant 0 : i32
    return %arg1, %c0_i32 : i32, i32
  }
  func.func @transform_3(%arg0: i32, %arg1: i32) -> (i32, i32, i32, i32) {
    %c0_i32 = arith.constant 0 : i32
    %c0_i32_0 = arith.constant 0 : i32
    %c0_i32_1 = arith.constant 0 : i32
    %c0_i32_2 = arith.constant 0 : i32
    return %arg0, %c0_i32, %c0_i32_0, %c0_i32_1 : i32, i32, i32, i32
  }
  func.func @transform_4(%arg0: i32, %arg1: i32) -> (i32, i32, i32) {
    %c0_i32 = arith.constant 0 : i32
    %c0_i32_0 = arith.constant 0 : i32
    %c0_i32_1 = arith.constant 0 : i32
    return %arg0, %c0_i32, %c0_i32_0 : i32, i32, i32
  }
  func.func @transform_5(%arg0: i32, %arg1: i32) -> (i32, i32) {
    %c0_i32 = arith.constant 0 : i32
    %c0_i32_0 = arith.constant 0 : i32
    %c0_i32_1 = arith.constant 0 : i32
    return %c0_i32, %c0_i32_0 : i32, i32
  }
  func.func @transform_6(%arg0: i32, %arg1: i32) -> (i32, i32) {
    %c0_i32 = arith.constant 0 : i32
    %c0_i32_0 = arith.constant 0 : i32
    %c0_i32_1 = arith.constant 0 : i32
    return %c0_i32, %c0_i32_0 : i32, i32
  }
}

</mosaic_0001>

<bundles_post_ra>
// kernel: tpu_custom_call.1
= control target key start
LH: loop header
LB: loop body
LE: loop exit
PB: predicated region body
PF: predicated region fallthrough
CT: control target
= control target key end

     0   :  { %12 = vsyncpa [#allocation7], 0  ;;  %s2769_s0 = inlined_call_operand.vmem [shape: bf16[128,128], index: 0, kind: input, shape index: {}]   ;;  %s2770_s1 = inlined_call_operand.vmem [shape: bf16[128,128], index: 1, kind: input, shape index: {}]   ;;  %s2771_s2 = inlined_call_operand.vmem [shape: f32[128,1], index: 2, kind: input, shape index: {}]   ;;  %s2772_s3 = inlined_call_operand.hbm [shape: bf16[2,2,128,128], index: 3, kind: input, shape index: {}]   ;;  %s2773_s4 = inlined_call_operand.vmem [shape: f32[2,1,128], index: 4, kind: input, shape index: {}]   ;;  %s2774_s5 = inlined_call_operand.hbm [shape: bf16[128,128], index: 5, kind: input, shape index: {}]   ;;  %s2775_s6 = inlined_call_operand.vmem [shape: f32[1,128], index: 6, kind: input, shape index: {}]   ;;  %s2776_s7 = inlined_call_operand.hbm [shape: f32[128,128], index: 7, kind: output, shape index: {}]  }
   0x1   :  { %14 = vsyncpa [#allocation7 + $0x1], 0 }
   0x2   :  { %15 = vsyncpa [#allocation9], 0  ;;  %s2227_s24 = smov 0   ;;  %s2229_s25 = smov 0  }
   0x3   :  { %s2231_s26 = smov 0   ;;  %s2233_s27 = smov 0  }
   0x4   :  { %s2235_s28 = smov 0   ;;  %s2237_s29 = smov 0  }
   0x5 LB: > { %s1529_s30 = sadd.s32 4294967295, %s2179_s29   ;;  %p69_p0 = scmp.ne.s32.totalorder %s2163_s25, %s2159_s24  ;;  %s2179_s29 = sphi %s2237_s29, %s21_s29   ;;  %s2175_s28 = sphi %s2235_s28, %s2792_s28   ;;  %s2171_s27 = sphi %s2233_s27, %s2791_s27   ;;  %s2167_s26 = sphi %s2231_s26, %s2790_s26   ;;  %s2163_s25 = sphi %s2229_s25, %s2789_s25   ;;  %s2159_s24 = sphi %s2227_s24, %s2788_s24  }
   0x6   : > { %p2257_p1 = scmp.eq.s32.totalorder %s1529_s30, 0  ;;  %p1857_p3 = scmp.ge.s32.totalorder %s2179_s29, 1 }
   0x7   : > { %s2181_s10 = smov [#allocation8]   ;;  %s2037_s15 = scalar_lea.hbm %s2774_s5, 1024 }
   0x8   : > { %s2780_s8 = scalar_select %p2257_p1, 1, 0 }
   0x9   : > { %p2265_p4 = por %p2257_p1, %p69_p0  ;;  %s139_s11 = sshll.u32 %s2181_s10, 4  ;;  %s140_s11 = int_to_ptr.vmem [resolvable:$true] %s139_s11 }
   0xa   : > { %p2271_p5 = pnand %p1857_p3, %p2257_p1  ;;  %p2038_p6 = scmp.ne.s32.totalorder %s2774_s5, %s2037_s15 }
   0xb   : > { %s2781_s9 = scalar_select %p2265_p4, 1, 0 }
   0xc   : > { %p2039_p7 = pneg %p2271_p5  ;;  %p2044_p10 = scmp.lt.u32.totalorder %s2037_s15, %s2774_s5 }
   0xe   : > { %p2040_p8 = pnand %p2039_p7, %p2038_p6 }
  0x10   : > { %p2041_p9 = pneg %p2040_p8 }
  0x12   : > { %p2046_p11 = pnand %p2044_p10, %p2041_p9 }
  0x14   : > { %2049 = shalt.err (!%p2046_p11)
}
  0x15   : > { %s2050_s20 = scalar_lea.vmem %s140_s11, 1024  ;;  %p2058_p3 = scmp.lt.s32.totalorder %s140_s11, %s140_s11 }
  0x16   : > { %p2051_p12 = scmp.ne.s32.totalorder %s140_s11, %s2050_s20  ;;  %p2059_p2 = scmp.lt.s32.totalorder %s2050_s20, %s2050_s20 }
  0x18   : > { %p2053_p13 = pnand %p2051_p12, %p2039_p7  ;;  %p2060_p1 = por %p2059_p2, %p2058_p3 }
  0x1a   : > { %p2054_p0 = pneg %p2053_p13 }
  0x1c   : > { %p2061_p4 = pnand %p2060_p1, %p2054_p0 }
  0x1e   : > { %2064 = shalt.err (!%p2061_p4)
}
  0x1f   : > { %s2182_s21 = smov 64   ;;  %s2183_s22 = smov 4  }
  0x20   : > { %1852 = dma.hbm_to_vmem [thread:$0]  (!%p2271_p5), %s2774_s5, 1024, %s140_s11, [#allocation9], %s2182_s21, %s2182_s21, %s2183_s22  }
  0x21   : > { %s30_s30 = sadd.s32 1, %s2175_s28  ;;  %p62_p1 = scmp.ne.s32.totalorder %s2167_s26, %s2163_s25 }
  0x22   : > { %p32_p2 = scmp.ge.s32.totalorder %s30_s30, 2  ;;  %p63_p4 = scmp.eq.s32.totalorder %s2179_s29, 0 }
  0x23   : > { %s56_s10 = sadd.s32 1, %s2167_s26  ;;  %s156_s13 = sand.u32 1, %s2167_s26  }
  0x24   : > { %s2794_s30 = smov (%p32_p2, %s30_s30), 0  ;;  %p64_p6 = por %p63_p4, %p62_p1 }
  0x25   : > { %p1859_p7 = scmp.lt.s32.totalorder %s2179_s29, 2  ;;  %s53_s12 = ssub.s32 %s2175_s28, %s2794_s30 }
  0x26   : > { %s1535_s14 = sshll.u32 %s156_s13, 7  ;;  %p54_p8 = scmp.eq.s32.totalorder %s53_s12, 0 }
  0x27   : > { %s1599_s15 = sshll.u32 %s2175_s28, 11  ;;  %s160_s16 = scalar_lea.vmem [#allocation6], %s1535_s14 }
  0x28   : > { %s167_s17 = sshll.u32 %s160_s16, 4  ;;  %s2312_s20 = scalar_lea.hbm %s2772_s3, %s1599_s15  ;;  %s2314_s17 = int_to_ptr.vmem [resolvable:$true] %s167_s17 }
  0x29   : > { %s2307_s18 = scalar_select %p54_p8, %s2167_s26, %s56_s10  }
  0x2a   : > { %p2316_p5 = pnand %p1859_p7, %p64_p6  ;;  %s2320_s24 = scalar_lea.sflag [#allocation7], %s156_s13 }
  0x2b   : > { %s2065_s10 = scalar_lea.hbm %s2312_s20, 2048  ;;  %s2070_s15 = scalar_lea.hbm %s2772_s3, 4096 }
  0x2c   : > { %p2066_p9 = scmp.ne.s32.totalorder %s2312_s20, %s2065_s10  ;;  %p2067_p10 = pneg %p2316_p5 }
  0x2d   : > { %p2071_p13 = scmp.lt.u32.totalorder %s2312_s20, %s2772_s3  ;;  %p2072_p0 = scmp.lt.u32.totalorder %s2070_s15, %s2065_s10 }
  0x2e   : > { %p2068_p11 = pnand %p2067_p10, %p2066_p9  ;;  %p2074_p1 = scmp.lt.u32.totalorder %s2065_s10, %s2312_s20 }
  0x2f   : > { %p2073_p3 = por %p2072_p0, %p2071_p13 }
  0x30   : > { %p2069_p12 = pneg %p2068_p11 }
  0x31   : > { %p2075_p2 = por %p2074_p1, %p2073_p3 }
  0x33   : > { %p2076_p4 = pnand %p2075_p2, %p2069_p12 }
  0x35   : > { %2079 = shalt.err (!%p2076_p4)
}
  0x36   : > { %s2080_s13 = scalar_lea.vmem %s2314_s17, 2048  ;;  %s2184_s19 = smov [#allocation6]  }
  0x37   : > { %p2081_p6 = scmp.ne.s32.totalorder %s2314_s17, %s2080_s13  ;;  %s2085_s12 = sshll.u32 %s2184_s19, 4  ;;  %s2086_s12 = int_to_ptr.vmem [resolvable:$false] %s2085_s12 }
  0x38   : > { %s2087_s14 = scalar_lea.vmem %s2086_s12, 4096  ;;  %p2088_p9 = scmp.lt.s32.totalorder %s2314_s17, %s2086_s12 }
  0x39   : > { %p2083_p7 = pnand %p2081_p6, %p2067_p10  ;;  %p2089_p11 = scmp.lt.s32.totalorder %s2087_s14, %s2080_s13 }
  0x3b   : > { %p2084_p8 = pneg %p2083_p7  ;;  %p2090_p13 = por %p2089_p11, %p2088_p9 }
  0x3d   : > { %p2091_p0 = pnand %p2090_p13, %p2084_p8 }
  0x3f   : > { %2094 = shalt.err (!%p2091_p0)
}
  0x40   : > { %1856 = dma.hbm_to_vmem [thread:$0]  (!%p2316_p5), %s2312_s20, 2048, %s2314_s17, %s2320_s24, %s2182_s21, %s2182_s21, %s2183_s22  }
  0x41   : > { %p2784_p10 = scmp.lt.s32.totalorder %s2179_s29, 1 }
  0x42   : > { %s185_s10 = sand.u32 (!%p2784_p10), 1, %s2163_s25   ;;  %p2785_p12 = scmp.ne.s32.totalorder (!%p2784_p10), %s2781_s9, 0 }
  0x43   : > { %183 = sbr.rel (%p2784_p10) target bundleno = 1213 (0x4bd), region = 40  ;;  %s1540_s15 = sshll.u32 (!%p2784_p10), %s185_s10, 7 }
  0x44   : > { %s186_s16 = scalar_lea.sflag (!%p2784_p10), [#allocation7], %s185_s10  ;;  %s2354_s11 = scalar_lea.vmem (!%p2784_p10), [#allocation6], %s1540_s15 }
  0x4a   : > { %2142 = dma.done.wait (%p2785_p12), %s186_s16, 2048  }
  0x4b   : > { %2144 = vsyncadd (%p2785_p12), %s186_s16, 4294965248  ;;  %p2786_p3 = scmp.ne.s32.totalorder %s2780_s8, 0 }
  0x4d   : > { %2146 = dma.done.wait (%p2786_p3), [#allocation9], 1024  }
  0x4e   : > { %2148 = vsyncadd (%p2786_p3), [#allocation9], 4294966272  ;;  %p227_p5 = scmp.lt.s32.totalorder %s2171_s27, 1  ;;  %p231_p1 = scmp.eq.s32.totalorder %s2171_s27, 0 }
  0x4f   : > { %v270_v0 = vld [vmem:[%s2770_s1] sm:$0xff] (%p231_p1)  ;;  %v272_v1 = vld [vmem:[%s2770_s1 + $0x8] sm:$0xff] (%p231_p1)  ;;  %v274_v2 = vld [vmem:[%s2770_s1 + $0x10] sm:$0xff] (%p231_p1) }
  0x50   : > { %s2367_s21 = scalar_select %p227_p5, %s2171_s27, 1 }
  0x51   : > { %236 = sbr.rel (!%p231_p1) target bundleno = 96 (0x60), region = 52  ;;  %271 = vst [vmem:[#allocation3] sm:$0xff] (%p231_p1), %v270_v0  ;;  %273 = vst [vmem:[#allocation3 + $0x8] sm:$0xff] (%p231_p1), %v272_v1  ;;  %v276_v3 = vld [vmem:[%s2770_s1 + $0x18] sm:$0xff] (%p231_p1)  ;;  %v278_v4 = vld [vmem:[%s2770_s1 + $0x20] sm:$0xff] (%p231_p1) }
  0x52   : > { %275 = vst [vmem:[#allocation3 + $0x10] sm:$0xff] (%p231_p1), %v274_v2  ;;  %v280_v5 = vld [vmem:[%s2770_s1 + $0x28] sm:$0xff] (%p231_p1)  ;;  %277 = vst [vmem:[#allocation3 + $0x18] sm:$0xff] (%p231_p1), %v276_v3  ;;  %v282_v6 = vld [vmem:[%s2770_s1 + $0x30] sm:$0xff] (%p231_p1) }
  0x53   : > { %279 = vst [vmem:[#allocation3 + $0x20] sm:$0xff] (%p231_p1), %v278_v4  ;;  %281 = vst [vmem:[#allocation3 + $0x28] sm:$0xff] (%p231_p1), %v280_v5  ;;  %v284_v7 = vld [vmem:[%s2770_s1 + $0x38] sm:$0xff] (%p231_p1) }
  0x54   : > { %283 = vst [vmem:[#allocation3 + $0x30] sm:$0xff] (%p231_p1), %v282_v6  ;;  %285 = vst [vmem:[#allocation3 + $0x38] sm:$0xff] (%p231_p1), %v284_v7 }
  0x58   : > { %293 = vsyncadd [#allocation5 + $0x1], 1024  ;;  %v326_v8 = vld [vmem:[%s2769_s0] sm:$0xff]  ;;  %v328_v9 = vld [vmem:[%s2769_s0 + $0x8] sm:$0xff] }
  0x59   : > { %327 = vst [vmem:[#allocation2] sm:$0xff] %v326_v8  ;;  %329 = vst [vmem:[#allocation2 + $0x8] sm:$0xff] %v328_v9  ;;  %v330_v10 = vld [vmem:[%s2769_s0 + $0x10] sm:$0xff]  ;;  %v332_v11 = vld [vmem:[%s2769_s0 + $0x18] sm:$0xff] }
  0x5a   : > { %v334_v12 = vld [vmem:[%s2769_s0 + $0x20] sm:$0xff]  ;;  %331 = vst [vmem:[#allocation2 + $0x10] sm:$0xff] %v330_v10  ;;  %333 = vst [vmem:[#allocation2 + $0x18] sm:$0xff] %v332_v11  ;;  %v336_v13 = vld [vmem:[%s2769_s0 + $0x28] sm:$0xff] }
  0x5b   : > { %335 = vst [vmem:[#allocation2 + $0x20] sm:$0xff] %v334_v12  ;;  %v338_v14 = vld [vmem:[%s2769_s0 + $0x30] sm:$0xff]  ;;  %v340_v15 = vld [vmem:[%s2769_s0 + $0x38] sm:$0xff]  ;;  %337 = vst [vmem:[#allocation2 + $0x28] sm:$0xff] %v336_v13 }
  0x5c   : > { %339 = vst [vmem:[#allocation2 + $0x30] sm:$0xff] %v338_v14  ;;  %341 = vst [vmem:[#allocation2 + $0x38] sm:$0xff] %v340_v15 }
  0x5d   : > { %349 = vsyncadd [#allocation5], 1024 }
  0x5e   : > { %2149 = dma.done.wait [#allocation5 + $0x1], 1024 }
  0x5f   : > { %2150 = vsyncadd [#allocation5 + $0x1], 4294966272 }
  0x60 PF: > { %2152 = dma.done.wait (%p231_p1), [#allocation5], 1024 }
  0x61   : > { %2154 = vsyncadd (%p231_p1), [#allocation5], 4294966272  ;;  %p362_p2 = scmp.lt.s32.totalorder %s2171_s27, 0  ;;  %s363_s12 = ssub.s32 0, %s2171_s27  ;;  %v2185_v16 = vmov 0   ;;  %v382_v17 = vld [vmem:[#allocation2] sm:$0xff] }
  0x62   : > { %s1544_s14 = smin.u32 %s2171_s27, %s363_s12  ;;  %1916 = vset.pattern.permute.xlu1 %v2185_v16  ;;  %1915 = vset.pattern.permute.xlu0 %v2185_v16  ;;  %v501_v18 = vld [vmem:[%s2771_s2 + $0x10] sm:$0xff]  ;;  %v499_v19 = vld [vmem:[%s2771_s2] sm:$0xff]  ;;  %v502_v20 = vld [vmem:[%s2771_s2 + $0x18] sm:$0xff]  ;;  %s2787_s22 = scalar_lea.vmem %s2773_s4, %s2367_s21 }
  0x63   : > { %s365_s10 = sand.u32 1, %s1544_s14   ;;  %1681 = vmatprep.mubr.bf16.mxu0 %v382_v17  ;;  %527 = vperm.xlu1 %1916, %v501_v18   ;;  %v500_v21 = vld [vmem:[%s2771_s2 + $0x8] sm:$0xff]  ;;  %v507_v25 = vld [vmem:[%s2771_s2 + $0x40] sm:$0xff]  ;;  %v510_v27 = vld [vmem:[%s2771_s2 + $0x58] sm:$0xff]  ;;  %p1584_p6 = scmp.ge.s32.totalorder %s2171_s27, 1 }
  0x64   : > { %s366_s15 = ssub.s32 0, %s365_s10  ;;  %517 = vperm.xlu0 %1915, %v499_v19   ;;  %v508_v24 = vld [vmem:[%s2771_s2 + $0x48] sm:$0xff]  ;;  %v1917_v28 = vld [vmem:[%s2354_s11 + $0x40] sm:$0xff]   ;;  %v509_v30 = vld [vmem:[%s2771_s2 + $0x50] sm:$0xff] }
  0x65   : > { %s2796_s15 = smov (!%p362_p2, %s366_s15), %s365_s10  ;;  %v1918_v29 = vld [vmem:[%s2354_s11 + $0x48] sm:$0xff]   ;;  %1697 = vmatprep.subr.bf16.mxu1 %v1917_v28  ;;  %v1919_v32 = vld [vmem:[%s2354_s11 + $0x50] sm:$0xff]   ;;  %v503_v34 = vld [vmem:[%s2771_s2 + $0x20] sm:$0xff] }
  0x66   : > { %p1546_p4 = scmp.lt.s32.totalorder %s2796_s15, 0  ;;  %s372_s16 = sadd.s32 2, %s2796_s15  ;;  %1698 = vmatpush3.bf16.msra.mxu1 %v1917_v28  ;;  %v504_v33 = vld [vmem:[%s2771_s2 + $0x28] sm:$0xff]  ;;  %v1920_v36 = vld [vmem:[%s2354_s11 + $0x58] sm:$0xff]   ;;  %v505_v38 = vld [vmem:[%s2771_s2 + $0x30] sm:$0xff] }
  0x67   : > { %532 = vperm.xlu1 %1916, %v502_v20   ;;  %1699 = vmatprep.subr.bf16.mxu1 %v1918_v29  ;;  %v506_v37 = vld [vmem:[%s2771_s2 + $0x38] sm:$0xff]  ;;  %v512_v40 = vld [vmem:[%s2771_s2 + $0x68] sm:$0xff]  ;;  %v1921_v41 = vld [vmem:[%s2354_s11 + $0x60] sm:$0xff]  }
  0x68   : > { %s2798_s16 = smov (!%p1546_p4, %s372_s16), %s2796_s15  ;;  %522 = vperm.xlu0 %1915, %v500_v21   ;;  %v511_v42 = vld [vmem:[%s2771_s2 + $0x60] sm:$0xff]  ;;  %v1923_v44 = vld [vmem:[%s2354_s11 + $0x68] sm:$0xff]   ;;  %v514_v45 = vld [vmem:[%s2771_s2 + $0x78] sm:$0xff] }
  0x69   : > { %s1547_s9 = sshll.u32 %s2798_s16, 7  ;;  %s375_s23 = ssub.s32 1, %s2798_s16  ;;  %v513_v46 = vld [vmem:[%s2771_s2 + $0x70] sm:$0xff]  ;;  %v1922_v49 = vld [vmem:[%s2354_s11] sm:$0xff]   ;;  %v1927_v50 = vld [vmem:[%s2354_s11 + $0x78] sm:$0xff]  }
  0x6a   : > { %s2436_s13 = sshll.u32 %s375_s23, 7  ;;  %s390_s19 = sshra.s32 %s1547_s9, 4  ;;  %1700 = vmatpush3.bf16.msra.mxu1 %v1918_v29  ;;  %v1925_v48 = vld [vmem:[%s2354_s11 + $0x70] sm:$0xff]   ;;  %v383_v51 = vld [vmem:[#allocation2 + $0x8] sm:$0xff]  ;;  %v385_v55 = vld [vmem:[#allocation2 + $0x18] sm:$0xff] }
  0x6b   : > { %s1549_s10 = sshll.u32 %s390_s19, 3  ;;  %562 = vperm.xlu1 %1916, %v508_v24   ;;  %1701 = vmatprep.subr.bf16.mxu1 %v1919_v32  ;;  %v384_v52 = vld [vmem:[#allocation2 + $0x10] sm:$0xff]  ;;  %v1924_v53 = vld [vmem:[%s2354_s11 + $0x8] sm:$0xff]   ;;  %v386_v56 = vld [vmem:[#allocation2 + $0x20] sm:$0xff]  ;;  %s1007_s21 = sshra.s32 (!%p1584_p6), %s2436_s13, 4 }
  0x6c   : > { %s2444_s16 = scalar_lea.vmem [#allocation3], %s1549_s10  ;;  %557 = vperm.xlu0 %1915, %v507_v25   ;;  %v1926_v54 = vld [vmem:[%s2354_s11 + $0x10] sm:$0xff]   ;;  %v1928_v57 = vld [vmem:[%s2354_s11 + $0x18] sm:$0xff]   ;;  %v1929_v58 = vld [vmem:[%s2354_s11 + $0x20] sm:$0xff]   ;;  %s1585_s17 = sshll.u32 (!%p1584_p6), %s1007_s21, 3 }
  0x6d   : > { %v394_v22 = vld [vmem:[%s2444_s16] sm:$0xff]  ;;  %v2448_v23 = vld [vmem:[%s2444_s16 + $0x8] sm:$0xff]  ;;  %v2458_v26 = vld [vmem:[%s2444_s16 + $0x10] sm:$0xff]  ;;  %s1010_s13 = scalar_lea.vmem (!%p1584_p6), [#allocation3], %s1585_s17 }
  0x6e   : > { %1665 = vmatprep.subr.bf16.mxu0 %v394_v22  ;;  %1713 = vmatprep.mubr.bf16.mxu1 %v394_v22  ;;  %v2471_v31 = vld [vmem:[%s2444_s16 + $0x18] sm:$0xff]  ;;  %v2483_v35 = vld [vmem:[%s2444_s16 + $0x20] sm:$0xff]  ;;  %v2495_v39 = vld [vmem:[%s2444_s16 + $0x28] sm:$0xff] }
  0x6f   : > { %1666 = vmatpush3.bf16.msra.mxu0 %v394_v22  ;;  %572 = vperm.xlu1 %1916, %v510_v27   ;;  %v2507_v43 = vld [vmem:[%s2444_s16 + $0x30] sm:$0xff]  ;;  %v2519_v47 = vld [vmem:[%s2444_s16 + $0x38] sm:$0xff]  ;;  %v387_v59 = vld [vmem:[#allocation2 + $0x28] sm:$0xff] }
  0x70   : > { %1667 = vmatprep.subr.bf16.mxu0 %v2448_v23  ;;  %567 = vperm.xlu0 %1915, %v509_v30   ;;  %v388_v60 = vld [vmem:[#allocation2 + $0x30] sm:$0xff]  ;;  %v1930_v61 = vld [vmem:[%s2354_s11 + $0x28] sm:$0xff]   ;;  %v389_v62 = vld [vmem:[#allocation2 + $0x38] sm:$0xff] }
  0x71   : > { %1702 = vmatpush3.bf16.msra.mxu1 %v1919_v32  ;;  %v1931_v63 = vld [vmem:[%s2354_s11 + $0x30] sm:$0xff]   ;;  %v1932_v0 = vld [vmem:[%s2354_s11 + $0x38] sm:$0xff]  }
  0x72   : > { %1703 = vmatprep.subr.bf16.mxu1 %v1920_v36 }
  0x73   : > { %1668 = vmatpush3.bf16.msra.mxu0 %v2448_v23  ;;  %542 = vperm.xlu1 %1916, %v504_v33  }
  0x74   : > { %1669 = vmatprep.subr.bf16.mxu0 %v2458_v26  ;;  %537 = vperm.xlu0 %1915, %v503_v34  }
  0x75   : > { %1704 = vmatpush3.bf16.msra.mxu1 %v1920_v36 }
  0x76   : > { %1705 = vmatprep.subr.bf16.mxu1 %v1921_v41 }
  0x77   : > { %1670 = vmatpush3.bf16.msra.mxu0 %v2458_v26  ;;  %552 = vperm.xlu1 %1916, %v506_v37  }
  0x78   : > { %1671 = vmatprep.subr.bf16.mxu0 %v2471_v31  ;;  %547 = vperm.xlu0 %1915, %v505_v38  }
  0x79   : > { %1706 = vmatpush3.bf16.msra.mxu1 %v1921_v41 }
  0x7a   : > { %1707 = vmatprep.subr.bf16.mxu1 %v1923_v44 }
  0x7b   : > { %1672 = vmatpush3.bf16.msra.mxu0 %v2471_v31  ;;  %582 = vperm.xlu1 %1916, %v512_v40  }
  0x7c   : > { %1673 = vmatprep.subr.bf16.mxu0 %v2483_v35  ;;  %577 = vperm.xlu0 %1915, %v511_v42  }
  0x7d   : > { %1708 = vmatpush3.bf16.msra.mxu1 %v1923_v44 }
  0x7e   : > { %1709 = vmatprep.subr.bf16.mxu1 %v1925_v48 }
  0x7f   : > { %1674 = vmatpush3.bf16.msra.mxu0 %v2483_v35  ;;  %592 = vperm.xlu1 %1916, %v514_v45  }
  0x80   : > { %1675 = vmatprep.subr.bf16.mxu0 %v2495_v39  ;;  %587 = vperm.xlu0 %1915, %v513_v46  }
  0x81   : > { %1710 = vmatpush3.bf16.msra.mxu1 %v1925_v48 }
  0x82   : > { %1711 = vmatprep.subr.bf16.mxu1 %v1927_v50 }
  0x83   : > { %1676 = vmatpush3.bf16.msra.mxu0 %v2495_v39 }
  0x84   : > { %1677 = vmatprep.subr.bf16.mxu0 %v2507_v43 }
  0x85   : > { %1712 = vmatpush3.bf16.msra.mxu1 %v1927_v50 }
  0x86   : > { %1793 = vmatprep.subr.bf16.mxu1 %v1922_v49 }
  0x87   : > { %1678 = vmatpush3.bf16.msra.mxu0 %v2507_v43 }
  0x88   : > { %1679 = vmatprep.subr.bf16.mxu0 %v2519_v47  ;;  %1714 = vmatmul.mubr.bf16.vlgmr.msra.gmra.mrb[0].mxu1 %v2448_v23 }
  0x89   : > { %1801 = vmatpush3.bf16.msra.mxu1 %v1922_v49  ;;  %1717 = vmatprep.mubr.bf16.mxu1 %v2458_v26 }
  0x8a   : > { %1794 = vmatprep.subr.bf16.mxu1 %v1924_v53 }
  0x8b   : > { %1680 = vmatpush3.bf16.msra.mxu0 %v2519_v47 }
  0x8c   : > { %1729 = vmatprep.subr.bf16.mxu0 %v1922_v49 }
  0x8d   : > { %1802 = vmatpush3.bf16.msra.mxu1 %v1924_v53 }
  0x8e   : > { %1682 = vmatmul.mubr.bf16.vlgmr.msra.gmra.mrb[0].mxu0 %v383_v51  ;;  %1795 = vmatprep.subr.bf16.mxu1 %v1926_v54 }
  0x8f   : > { %1685 = vmatprep.mubr.bf16.mxu0 %v384_v52  ;;  %1730 = vmatpush3.bf16.msra.mxu0 %v1922_v49 }
  0x90   : > { %1731 = vmatprep.subr.bf16.mxu0 %v1924_v53  ;;  %1718 = vmatmul.mubr.bf16.gmra.mrb[4].mxu1 %v2471_v31 }
  0x91   : > { %1803 = vmatpush3.bf16.msra.mxu1 %v1926_v54  ;;  %1721 = vmatprep.mubr.bf16.mxu1 %v2483_v35 }
  0x92   : > { %1796 = vmatprep.subr.bf16.mxu1 %v1928_v57 }
  0x93   : > { %1732 = vmatpush3.bf16.msra.mxu0 %v1924_v53 }
  0x94   : > { %1733 = vmatprep.subr.bf16.mxu0 %v1926_v54 }
  0x95   : > { %1804 = vmatpush3.bf16.msra.mxu1 %v1928_v57 }
  0x96   : > { %1686 = vmatmul.mubr.bf16.gmra.mrb[4].mxu0 %v385_v55  ;;  %1797 = vmatprep.subr.bf16.mxu1 %v1929_v58 }
  0x97   : > { %1689 = vmatprep.mubr.bf16.mxu0 %v386_v56  ;;  %1734 = vmatpush3.bf16.msra.mxu0 %v1926_v54 }
  0x98   : > { %1735 = vmatprep.subr.bf16.mxu0 %v1928_v57  ;;  %1722 = vmatmul.mubr.bf16.gmra.mrb[8].mxu1 %v2495_v39 }
  0x99   : > { %1805 = vmatpush3.bf16.msra.mxu1 %v1929_v58  ;;  %1725 = vmatprep.mubr.bf16.mxu1 %v2507_v43 }
  0x9a   : > { %1798 = vmatprep.subr.bf16.mxu1 %v1930_v61 }
  0x9b   : > { %1736 = vmatpush3.bf16.msra.mxu0 %v1928_v57 }
  0x9c   : > { %1737 = vmatprep.subr.bf16.mxu0 %v1929_v58 }
  0x9d   : > { %1806 = vmatpush3.bf16.msra.mxu1 %v1930_v61 }
  0x9e   : > { %1690 = vmatmul.mubr.bf16.gmra.mrb[8].mxu0 %v387_v59  ;;  %1799 = vmatprep.subr.bf16.mxu1 %v1931_v63 }
  0x9f   : > { %1693 = vmatprep.mubr.bf16.mxu0 %v388_v60  ;;  %1738 = vmatpush3.bf16.msra.mxu0 %v1929_v58 }
  0xa0   : > { %1739 = vmatprep.subr.bf16.mxu0 %v1930_v61  ;;  %1726 = vmatmul.mubr.bf16.gmra.mrb[12].mxu1 %v2519_v47 }
  0xa1   : > { %1807 = vmatpush3.bf16.msra.mxu1 %v1931_v63 }
  0xa2   : > { %1800 = vmatprep.subr.bf16.mxu1 %v1932_v0 }
  0xa3   : > { %1740 = vmatpush3.bf16.msra.mxu0 %v1930_v61 }
  0xa4   : > { %1741 = vmatprep.subr.bf16.mxu0 %v1931_v63 }
  0xa5   : > { %1808 = vmatpush3.bf16.msra.mxu1 %v1932_v0 }
  0xa6   : > { %1694 = vmatmul.mubr.bf16.gmra.mrb[12].mxu0 %v389_v62 }
  0xa7   : > { %1742 = vmatpush3.bf16.msra.mxu0 %v1931_v63 }
  0xa8   : > { %1743 = vmatprep.subr.bf16.mxu0 %v1932_v0 }
  0xab   : > { %1744 = vmatpush3.bf16.msra.mxu0 %v1932_v0 }
  0xe2   : > { %v528_v1 = vpop.permute.xlu1 %527 }
  0xe3   : > { %v518_v2 = vpop.permute.xlu0 %517 }
  0xe6   : > { %v533_v3 = vpop.permute.xlu1 %532 }
  0xe7   : > { %v523_v4 = vpop.permute.xlu0 %522 }
  0xea   : > { %v563_v5 = vpop.permute.xlu1 %562 }
  0xeb   : > { %v558_v6 = vpop.permute.xlu0 %557 }
  0xee   : > { %v573_v7 = vpop.permute.xlu1 %572 }
  0xef   : > { %v568_v8 = vpop.permute.xlu0 %567 }
  0xf2   : > { %v543_v12 = vpop.permute.xlu1 %542 }
  0xf3   : > { %v538_v16 = vpop.permute.xlu0 %537 }
  0xf6   : > { %v553_v26 = vpop.permute.xlu1 %552 }
  0xf7   : > { %v548_v28 = vpop.permute.xlu0 %547 }
  0xfa   : > { %v583_v44 = vpop.permute.xlu1 %582 }
  0xfb   : > { %v578_v48 = vpop.permute.xlu0 %577 }
  0xfe   : > { %v593_v54 = vpop.permute.xlu1 %592 }
  0xff   : > { %v588_v56 = vpop.permute.xlu0 %587 }
 0x15b   : > { %v1715_v20 = vpop.f32.mrb[0].mxu1 }
 0x15c   : > { %v747_v22 = vpop.f32.mrb[1].mxu1 }
 0x15d   : > { %v1716_v23 = vpop.f32.mrb[2].mxu1 }
 0x15e   : > { %v750_v25 = vpop.f32.mrb[3].mxu1 }
 0x161   : > { %v1683_v9 = vpop.f32.mrb[0].mxu0 }
 0x162   : > { %v436_v10 = vpop.f32.mrb[1].mxu0  ;;  %v597_v13 = vmul.f32 %v1683_v9, %v528_v1 }
 0x163   : > { %v1684_v11 = vpop.f32.mrb[2].mxu0  ;;  %v595_v17 = vmul.f32 %v518_v2, %v436_v10  ;;  %v1719_v36 = vpop.f32.mrb[4].mxu1  ;;  %v1583_v2 = vld [vmem:[%s2787_s22] ss:$0 sm:$0xff] }
 0x164   : > { %v598_v14 = vmul.f32 %v1684_v11, %v533_v3  ;;  %v439_v15 = vpop.f32.mrb[3].mxu0  ;;  %v763_v38 = vpop.f32.mrb[5].mxu1 }
 0x165   : > { %v596_v18 = vmul.f32 %v523_v4, %v439_v15  ;;  %v1720_v39 = vpop.f32.mrb[6].mxu1 }
 0x166   : > { %v625_v19 = vpack.c.bf16 %v598_v14, %v597_v13  ;;  %v766_v41 = vpop.f32.mrb[7].mxu1 }
 0x167   : > { %v624_v21 = vpack.c.bf16 %v596_v18, %v595_v17 }
 0x169   : > { %v1687_v24 = vpop.f32.mrb[4].mxu0  ;;  %1745 = vmatprep.mubr.bf16.mxu0 %v624_v21 }
 0x16a   : > { %v452_v27 = vpop.f32.mrb[5].mxu0  ;;  %1746 = vmatmul.mubr.bf16.vlgmr.msra.gmra.mrb[16].mxu0 %v625_v19  ;;  %v601_v30 = vmul.f32 %v1687_v24, %v548_v28 }
 0x16b   : > { %v1688_v29 = vpop.f32.mrb[6].mxu0  ;;  %v599_v33 = vmul.f32 %v538_v16, %v452_v27 }
 0x16c   : > { %v602_v31 = vmul.f32 %v1688_v29, %v553_v26  ;;  %v455_v32 = vpop.f32.mrb[7].mxu0 }
 0x16d   : > { %v600_v34 = vmul.f32 %v543_v12, %v455_v32 }
 0x16e   : > { %v627_v35 = vpack.c.bf16 %v602_v31, %v601_v30 }
 0x16f   : > { %v626_v37 = vpack.c.bf16 %v600_v34, %v599_v33 }
 0x171   : > { %v1691_v40 = vpop.f32.mrb[8].mxu0  ;;  %1749 = vmatprep.mubr.bf16.mxu0 %v626_v37 }
 0x172   : > { %v468_v42 = vpop.f32.mrb[9].mxu0  ;;  %1750 = vmatmul.mubr.bf16.gmra.mrb[20].mxu0 %v627_v35  ;;  %v605_v45 = vmul.f32 %v1691_v40, %v568_v8 }
 0x173   : > { %v1692_v43 = vpop.f32.mrb[10].mxu0  ;;  %v603_v49 = vmul.f32 %v558_v6, %v468_v42 }
 0x174   : > { %v606_v46 = vmul.f32 %v1692_v43, %v573_v7  ;;  %v471_v47 = vpop.f32.mrb[11].mxu0 }
 0x175   : > { %v604_v50 = vmul.f32 %v563_v5, %v471_v47 }
 0x176   : > { %v629_v51 = vpack.c.bf16 %v606_v46, %v605_v45 }
 0x177   : > { %v628_v52 = vpack.c.bf16 %v604_v50, %v603_v49 }
 0x179   : > { %v1695_v53 = vpop.f32.mrb[12].mxu0  ;;  %1753 = vmatprep.mubr.bf16.mxu1 %v628_v52 }
 0x17a   : > { %v484_v55 = vpop.f32.mrb[13].mxu0  ;;  %1754 = vmatmul.mubr.bf16.vlgmr.msra.gmra.mrb[8].mxu1 %v629_v51  ;;  %v609_v58 = vmul.f32 %v1695_v53, %v588_v56 }
 0x17b   : > { %v1696_v57 = vpop.f32.mrb[14].mxu0  ;;  %v607_v61 = vmul.f32 %v578_v48, %v484_v55 }
 0x17c   : > { %v610_v59 = vmul.f32 %v1696_v57, %v593_v54  ;;  %v487_v60 = vpop.f32.mrb[15].mxu0 }
 0x17d   : > { %v608_v62 = vmul.f32 %v583_v44, %v487_v60 }
 0x17e   : > { %v631_v63 = vpack.c.bf16 %v610_v59, %v609_v58 }
 0x17f   : > { %v630_v0 = vpack.c.bf16 %v608_v62, %v607_v61 }
 0x181   : > { %1757 = vmatprep.mubr.bf16.mxu1 %v630_v0 }
 0x182   : > { %1758 = vmatmul.mubr.bf16.gmra.mrb[12].mxu1 %v631_v63 }
 0x23d   : > { %v1747_v1 = vpop.f32.mrb[16].mxu0 }
 0x23e   : > { %v901_v3 = vadd.f32 %v1747_v1, %v1715_v20  ;;  %v892_v4 = vpop.f32.mrb[17].mxu0 }
 0x23f   : > { %v893_v5 = vadd.f32 %v892_v4, %v747_v22  ;;  %v1748_v6 = vpop.f32.mrb[18].mxu0 }
 0x240   : > { %v2546_v7 = vadd.f32 %v1583_v2, %v901_v3  ;;  %v904_v8 = vadd.f32 %v1748_v6, %v1716_v23  ;;  %v895_v9 = vpop.f32.mrb[19].mxu0 }
 0x241   : > { %v2548_v10 = vadd.f32 %v1583_v2, %v893_v5  ;;  %v896_v11 = vadd.f32 %v895_v9, %v750_v25 }
 0x242   : > { %v2550_v12 = vadd.f32 %v1583_v2, %v904_v8  ;;  %v984_v44 = vmax.f32 (!%p1584_p6), %v2546_v7, 0.0 }
 0x243   : > { %v2552_v13 = vadd.f32 %v1583_v2, %v896_v11  ;;  %v982_v42 = vmax.f32 (!%p1584_p6), %v2548_v10, 0.0 }
 0x244   : > { %v985_v45 = vmax.f32 (!%p1584_p6), %v2550_v12, 0.0 }
 0x245   : > { %v1751_v14 = vpop.f32.mrb[20].mxu0  ;;  %v983_v43 = vmax.f32 (!%p1584_p6), %v2552_v13, 0.0 }
 0x246   : > { %v917_v15 = vadd.f32 %v1751_v14, %v1719_v36  ;;  %v908_v16 = vpop.f32.mrb[21].mxu0  ;;  %v999_v51 = vpack.c.bf16 (!%p1584_p6), %v985_v45, %v984_v44 }
 0x247   : > { %v909_v17 = vadd.f32 %v908_v16, %v763_v38  ;;  %v1752_v18 = vpop.f32.mrb[22].mxu0  ;;  %v998_v50 = vpack.c.bf16 (!%p1584_p6), %v983_v43, %v982_v42 }
 0x248   : > { %v2554_v19 = vadd.f32 %v1583_v2, %v917_v15  ;;  %v920_v20 = vadd.f32 %v1752_v18, %v1720_v39  ;;  %v911_v21 = vpop.f32.mrb[23].mxu0  ;;  %1012 = vst [vmem:[%s1010_s13 + $0x8] sm:$0xff] (!%p1584_p6), %v999_v51 }
 0x249   : > { %v2556_v22 = vadd.f32 %v1583_v2, %v909_v17  ;;  %v912_v23 = vadd.f32 %v911_v21, %v766_v41  ;;  %1011 = vst [vmem:[%s1010_s13] sm:$0xff] (!%p1584_p6), %v998_v50 }
 0x24a   : > { %v2558_v24 = vadd.f32 %v1583_v2, %v920_v20  ;;  %v988_v48 = vmax.f32 (!%p1584_p6), %v2554_v19, 0.0 }
 0x24b   : > { %v2560_v26 = vadd.f32 %v1583_v2, %v912_v23  ;;  %v986_v46 = vmax.f32 (!%p1584_p6), %v2556_v22, 0.0 }
 0x24c   : > { %v989_v49 = vmax.f32 (!%p1584_p6), %v2558_v24, 0.0 }
 0x24d   : > { %v1755_v25 = vpop.f32.mrb[8].mxu1  ;;  %v987_v47 = vmax.f32 (!%p1584_p6), %v2560_v26, 0.0 }
 0x24e   : > { %v2562_v27 = vadd.f32 %v1755_v25, %v1583_v2  ;;  %v924_v28 = vpop.f32.mrb[9].mxu1  ;;  %v1001_v55 = vpack.c.bf16 (!%p1584_p6), %v989_v49, %v988_v48 }
 0x24f   : > { %v970_v29 = vadd.f32 %v1583_v2, %v924_v28  ;;  %v1756_v30 = vpop.f32.mrb[10].mxu1  ;;  %v1000_v54 = vpack.c.bf16 (!%p1584_p6), %v987_v47, %v986_v46 }
 0x250   : > { %v2564_v31 = vadd.f32 %v1756_v30, %v1583_v2  ;;  %v927_v32 = vpop.f32.mrb[11].mxu1  ;;  %v992_v56 = vmax.f32 (!%p1584_p6), %v2562_v27, 0.0  ;;  %1014 = vst [vmem:[%s1010_s13 + $0x18] sm:$0xff] (!%p1584_p6), %v1001_v55 }
 0x251   : > { %v971_v33 = vadd.f32 %v1583_v2, %v927_v32  ;;  %v990_v52 = vmax.f32 (!%p1584_p6), %v970_v29, 0.0  ;;  %1013 = vst [vmem:[%s1010_s13 + $0x10] sm:$0xff] (!%p1584_p6), %v1000_v54 }
 0x252   : > { %v993_v57 = vmax.f32 (!%p1584_p6), %v2564_v31, 0.0 }
 0x253   : > { %981 = sbr.rel (%p1584_p6) target bundleno = 608 (0x260), region = 128  ;;  %v991_v53 = vmax.f32 (!%p1584_p6), %v971_v33, 0.0 }
 0x254   : > { %v1003_v62 = vpack.c.bf16 (!%p1584_p6), %v993_v57, %v992_v56 }
 0x255   : > { %v1759_v34 = vpop.f32.mrb[12].mxu1  ;;  %v1002_v58 = vpack.c.bf16 (!%p1584_p6), %v991_v53, %v990_v52 }
 0x256   : > { %v2566_v35 = vadd.f32 %v1759_v34, %v1583_v2  ;;  %v940_v36 = vpop.f32.mrb[13].mxu1  ;;  %1016 = vst [vmem:[%s1010_s13 + $0x28] sm:$0xff] (!%p1584_p6), %v1003_v62 }
 0x257   : > { %v2568_v37 = vadd.f32 %v1583_v2, %v940_v36  ;;  %v1760_v38 = vpop.f32.mrb[14].mxu1  ;;  %1015 = vst [vmem:[%s1010_s13 + $0x20] sm:$0xff] (!%p1584_p6), %v1002_v58 }
 0x258   : > { %v2570_v39 = vadd.f32 %v1760_v38, %v1583_v2  ;;  %v943_v40 = vpop.f32.mrb[15].mxu1  ;;  %v996_v61 = vmax.f32 (!%p1584_p6), %v2566_v35, 0.0 }
 0x259   : > { %v2572_v41 = vadd.f32 %v1583_v2, %v943_v40  ;;  %v994_v59 = vmax.f32 (!%p1584_p6), %v2568_v37, 0.0 }
 0x25a   : > { %v997_v63 = vmax.f32 %v2570_v39, 0.0 }
 0x25b   : > { %v995_v60 = vmax.f32 %v2572_v41, 0.0 }
 0x25c   : > { %v1005_v1 = vpack.c.bf16 %v997_v63, %v996_v61 }
 0x25d   : > { %v1004_v0 = vpack.c.bf16 %v995_v60, %v994_v59 }
 0x25e   : > { %1018 = vst [vmem:[%s1010_s13 + $0x38] sm:$0xff] %v1005_v1 }
 0x25f   : > { %1017 = vst [vmem:[%s1010_s13 + $0x30] sm:$0xff] %v1004_v0 }
 0x260 PF: > { %p1586_p7 = scmp.ne.s32.totalorder %s2171_s27, 1 }
 0x261   : > { %v1933_v2 = vld [vmem:[#allocation8] sm:$0xff] (!%p1586_p7)   ;;  %1941 = vtanh.f32 (!%p1586_p7), %v2548_v10  ;;  %v1934_v3 = vld [vmem:[#allocation8 + $0x8] sm:$0xff] (!%p1586_p7)   ;;  %v1935_v4 = vld [vmem:[#allocation8 + $0x10] sm:$0xff] (!%p1586_p7)   ;;  %v1215_v34 = vlaneseq (!%p1586_p7)  ;;  %s2186_s9 = smov (!%p1586_p7), [#allocation4]  }
 0x262   : > { %1022 = sbr.rel (%p1586_p7) target bundleno = 1213 (0x4bd), region = 132  ;;  %1943 = vtanh.f32 (!%p1586_p7), %v2552_v13  ;;  %1761 = vmatprep.subr.bf16.mxu0 (!%p1586_p7), %v1933_v2  ;;  %1825 = vmatprep.subr.bf16.mxu1 (!%p1586_p7), %v1933_v2  ;;  %v1936_v5 = vld [vmem:[#allocation8 + $0x18] sm:$0xff] (!%p1586_p7)   ;;  %v1937_v10 = vld [vmem:[#allocation8 + $0x20] sm:$0xff] (!%p1586_p7)   ;;  %s1404_s23 = sshll.u32 (!%p1586_p7), %s2186_s9, 4  ;;  %s1405_s23 = int_to_ptr.vmem [resolvable:$true] %s1404_s23 }
 0x263   : > { %1945 = vtanh.f32 (!%p1586_p7), %v970_v29  ;;  %1762 = vmatpush3.bf16.msra.mxu0 (!%p1586_p7), %v1933_v2  ;;  %1833 = vmatpush3.bf16.msra.mxu1 (!%p1586_p7), %v1933_v2  ;;  %v1940_v20 = vld [vmem:[#allocation8 + $0x38] sm:$0xff] (!%p1586_p7)   ;;  %v1587_v36 = vld [vmem:[%s2775_s6] ss:$0 sm:$0xff] (!%p1586_p7)  ;;  %s2095_s8 = scalar_lea.vmem (!%p1586_p7), %s1405_s23, 2048  ;;  %p2100_p9 = scmp.lt.s32.totalorder (!%p1586_p7), %s1405_s23, %s1405_s23 }
 0x264   : > { %1947 = vtanh.f32 (!%p1586_p7), %v971_v33  ;;  %1763 = vmatprep.subr.bf16.mxu0 (!%p1586_p7), %v1934_v3  ;;  %1826 = vmatprep.subr.bf16.mxu1 (!%p1586_p7), %v1934_v3  ;;  %p2096_p8 = scmp.ne.s32.totalorder (!%p1586_p7), %s1405_s23, %s2095_s8  ;;  %p2101_p11 = scmp.lt.s32.totalorder (!%p1586_p7), %s2095_s8, %s2095_s8 }
 0x265   : > { %1949 = vtanh.f32 (!%p1586_p7), %v2546_v7  ;;  %v1938_v7 = vld [vmem:[#allocation8 + $0x28] sm:$0xff] (!%p1586_p7)  }
 0x266   : > { %1951 = vtanh.f32 (!%p1586_p7), %v2550_v12  ;;  %v1939_v12 = vld [vmem:[#allocation8 + $0x30] sm:$0xff] (!%p1586_p7)   ;;  %p2102_p13 = por (!%p1586_p7), %p2101_p11, %p2100_p9 }
 0x267   : > { %1764 = vmatpush3.bf16.msra.mxu0 (!%p1586_p7), %v1934_v3  ;;  %1834 = vmatpush3.bf16.msra.mxu1 (!%p1586_p7), %v1934_v3  ;;  %1953 = vtanh.f32 (!%p1586_p7), %v2562_v27 }
 0x268   : > { %1765 = vmatprep.subr.bf16.mxu0 (!%p1586_p7), %v1935_v4  ;;  %1827 = vmatprep.subr.bf16.mxu1 (!%p1586_p7), %v1935_v4  ;;  %1955 = vtanh.f32 (!%p1586_p7), %v2564_v31  ;;  %p2103_p0 = pnand (!%p1586_p7), %p2102_p13, %p2096_p8 }
 0x269   : > { %1957 = vtanh.f32 %v2556_v22 }
 0x26a   : > { %1959 = vtanh.f32 %v2560_v26 }
 0x26b   : > { %v1942_v6 = vpop.eup %1941  ;;  %1766 = vmatpush3.bf16.msra.mxu0 %v1935_v4  ;;  %1835 = vmatpush3.bf16.msra.mxu1 %v1935_v4  ;;  %1961 = vtanh.f32 %v2568_v37 }
 0x26c   : > { %v1944_v8 = vpop.eup %1943  ;;  %1767 = vmatprep.subr.bf16.mxu0 %v1936_v5  ;;  %1828 = vmatprep.subr.bf16.mxu1 %v1936_v5  ;;  %1963 = vtanh.f32 %v2572_v41 }
 0x26d   : > { %v1946_v9 = vpop.eup %1945  ;;  %v1039_v11 = vpack.c.bf16 %v1944_v8, %v1942_v6  ;;  %1965 = vtanh.f32 %v2554_v19 }
 0x26e   : > { %v1948_v13 = vpop.eup %1947  ;;  %1967 = vtanh.f32 %v2558_v24 }
 0x26f   : > { %1777 = vmatprep.mubr.bf16.mxu0 %v1039_v11  ;;  %v1043_v14 = vpack.c.bf16 %v1948_v13, %v1946_v9  ;;  %1768 = vmatpush3.bf16.msra.mxu0 %v1936_v5  ;;  %v1950_v15 = vpop.eup %1949  ;;  %1969 = vtanh.f32 %v2566_v35  ;;  %v2605_v35 = vand.u32 127, %v1215_v34 }
 0x270   : > { %1836 = vmatpush3.bf16.msra.mxu1 %v1936_v5  ;;  %1769 = vmatprep.subr.bf16.mxu0 %v1937_v10  ;;  %v1952_v16 = vpop.eup %1951  ;;  %1971 = vtanh.f32 %v2570_v39 }
 0x271   : > { %1829 = vmatprep.subr.bf16.mxu1 %v1937_v10  ;;  %1785 = vmatprep.mubr.bf16.mxu1 %v1043_v14  ;;  %v1954_v17 = vpop.eup %1953  ;;  %v1040_v19 = vpack.c.bf16 %v1952_v16, %v1950_v15  ;;  %vm1217_vm0 = vcmp.lt.s32.totalorder %v2605_v35, 8 }
 0x272   : > { %v1956_v18 = vpop.eup %1955 }
 0x273   : > { %1770 = vmatpush3.bf16.msra.mxu0 %v1937_v10  ;;  %v1958_v21 = vpop.eup %1957  ;;  %v1044_v25 = vpack.c.bf16 %v1956_v18, %v1954_v17 }
 0x274   : > { %1837 = vmatpush3.bf16.msra.mxu1 %v1937_v10  ;;  %1771 = vmatprep.subr.bf16.mxu0 %v1938_v7  ;;  %v1960_v22 = vpop.eup %1959 }
 0x275   : > { %1830 = vmatprep.subr.bf16.mxu1 %v1938_v7  ;;  %v1962_v23 = vpop.eup %1961  ;;  %v1041_v24 = vpack.c.bf16 %v1960_v22, %v1958_v21 }
 0x276   : > { %v1964_v26 = vpop.eup %1963 }
 0x277   : > { %1772 = vmatpush3.bf16.msra.mxu0 %v1938_v7  ;;  %v1045_v27 = vpack.c.bf16 %v1964_v26, %v1962_v23  ;;  %v1966_v28 = vpop.eup %1965 }
 0x278   : > { %1838 = vmatpush3.bf16.msra.mxu1 %v1938_v7  ;;  %1773 = vmatprep.subr.bf16.mxu0 %v1939_v12  ;;  %v1968_v29 = vpop.eup %1967 }
 0x279   : > { %1831 = vmatprep.subr.bf16.mxu1 %v1939_v12  ;;  %v1970_v30 = vpop.eup %1969  ;;  %v1042_v32 = vpack.c.bf16 %v1968_v29, %v1966_v28 }
 0x27a   : > { %v1972_v31 = vpop.eup %1971 }
 0x27b   : > { %1774 = vmatpush3.bf16.msra.mxu0 %v1939_v12  ;;  %v1046_v33 = vpack.c.bf16 %v1972_v31, %v1970_v30 }
 0x27c   : > { %1839 = vmatpush3.bf16.msra.mxu1 %v1939_v12  ;;  %1775 = vmatprep.subr.bf16.mxu0 %v1940_v20 }
 0x27d   : > { %1832 = vmatprep.subr.bf16.mxu1 %v1940_v20 }
 0x27f   : > { %1776 = vmatpush3.bf16.msra.mxu0 %v1940_v20 }
 0x280   : > { %1840 = vmatpush3.bf16.msra.mxu1 %v1940_v20 }
 0x282   : > { %1778 = vmatmul.mubr.bf16.vlgmr.msra.gmra.mrb[0].mxu0 %v1040_v19 }
 0x283   : > { %1786 = vmatmul.mubr.bf16.vlgmr.msra.gmra.mrb[0].mxu1 %v1044_v25  ;;  %1781 = vmatprep.mubr.bf16.mxu0 %v1041_v24 }
 0x284   : > { %1789 = vmatprep.mubr.bf16.mxu1 %v1045_v27 }
 0x28a   : > { %1782 = vmatmul.mubr.bf16.gmra.mrb[4].mxu0 %v1042_v32 }
 0x28b   : > { %1790 = vmatmul.mubr.bf16.gmra.mrb[4].mxu1 %v1046_v33 }
 0x355   : > { %v1779_v37 = vpop.f32.mrb[0].mxu0 }
 0x356   : > { %v1787_v38 = vpop.f32.mrb[0].mxu1  ;;  %v1161_v39 = vadd.f32 %v1779_v37, %v1587_v36  ;;  %v1152_v41 = vpop.f32.mrb[1].mxu0 }
 0x357   : > { %v1193_v40 = vadd.f32 %v1787_v38, %v1587_v36  ;;  %v1184_v42 = vpop.f32.mrb[1].mxu1  ;;  %v1780_v43 = vpop.f32.mrb[2].mxu0  ;;  %v1153_v45 = vadd.f32 %v1587_v36, %v1152_v41 }
 0x358   : > { %v1788_v44 = vpop.f32.mrb[2].mxu1  ;;  %v1164_v46 = vadd.f32 %v1780_v43, %v1587_v36  ;;  %v1155_v47 = vpop.f32.mrb[3].mxu0  ;;  %v1220_v50 = vsel %vm1217_vm0, %v1161_v39, -1e+30  ;;  %v1185_v51 = vadd.f32 %v1587_v36, %v1184_v42 }
 0x359   : > { %v1187_v48 = vpop.f32.mrb[3].mxu1  ;;  %v1228_v49 = vsel %vm1217_vm0, %v1193_v40, -1e+30  ;;  %1238 = vmax.xlane.f32.xlu1 %v1220_v50  ;;  %v1196_v52 = vadd.f32 %v1788_v44, %v1587_v36  ;;  %v2619_v54 = vsel %vm1217_vm0, %v1153_v45, -1e+30  ;;  %v1156_v61 = vadd.f32 %v1587_v36, %v1155_v47 }
 0x35a   : > { %1254 = vmax.xlane.f32.xlu0 %v1228_v49  ;;  %v1221_v53 = vsel %vm1217_vm0, %v1164_v46, -1e+30  ;;  %v1188_v62 = vadd.f32 %v1587_v36, %v1187_v48  ;;  %v1226_v0 = vsel %vm1217_vm0, %v1185_v51, -1e+30 }
 0x35b   : > { %v1229_v63 = vsel %vm1217_vm0, %v1196_v52, -1e+30  ;;  %v1219_v6 = vsel %vm1217_vm0, %v1156_v61, -1e+30 }
 0x35c   : > { %v1227_v5 = vsel %vm1217_vm0, %v1188_v62, -1e+30 }
 0x35d   : > { %1240 = vmax.xlane.f32.xlu1 %v1221_v53  ;;  %v1783_v55 = vpop.f32.mrb[4].mxu0 }
 0x35e   : > { %1234 = vmax.xlane.f32.xlu0 %v2619_v54  ;;  %v1791_v56 = vpop.f32.mrb[4].mxu1  ;;  %v1168_v57 = vpop.f32.mrb[5].mxu0  ;;  %v1177_v3 = vadd.f32 %v1783_v55, %v1587_v36 }
 0x35f   : > { %v1200_v58 = vpop.f32.mrb[5].mxu1  ;;  %v1784_v59 = vpop.f32.mrb[6].mxu0  ;;  %v1169_v10 = vadd.f32 %v1587_v36, %v1168_v57  ;;  %v1209_v17 = vadd.f32 %v1791_v56, %v1587_v36 }
 0x360   : > { %v1792_v60 = vpop.f32.mrb[6].mxu1  ;;  %v1171_v1 = vpop.f32.mrb[7].mxu0  ;;  %v1180_v4 = vadd.f32 %v1784_v59, %v1587_v36  ;;  %v1224_v9 = vsel %vm1217_vm0, %v1177_v3, -1e+30  ;;  %v1201_v13 = vadd.f32 %v1587_v36, %v1200_v58 }
 0x361   : > { %v1203_v2 = vpop.f32.mrb[7].mxu1  ;;  %1256 = vmax.xlane.f32.xlu1 %v1229_v63  ;;  %v1172_v11 = vadd.f32 %v1587_v36, %v1171_v1  ;;  %v2643_v12 = vsel %vm1217_vm0, %v1169_v10, -1e+30  ;;  %v1212_v18 = vadd.f32 %v1792_v60, %v1587_v36  ;;  %v2663_v21 = vsel %vm1217_vm0, %v1209_v17, -1e+30 }
 0x362   : > { %1250 = vmax.xlane.f32.xlu0 %v1226_v0  ;;  %v2632_v8 = vsel %vm1217_vm0, %v1180_v4, -1e+30  ;;  %v1204_v14 = vadd.f32 %v1587_v36, %v1203_v2  ;;  %v2653_v16 = vsel %vm1217_vm0, %v1201_v13, -1e+30 }
 0x363   : > { %v2639_v7 = vsel %vm1217_vm0, %v1172_v11, -1e+30  ;;  %v2659_v20 = vsel %vm1217_vm0, %v1212_v18, -1e+30 }
 0x364   : > { %v2649_v15 = vsel %vm1217_vm0, %v1204_v14, -1e+30 }
 0x365   : > { %1252 = vmax.xlane.f32.xlu1 %v1227_v5 }
 0x366   : > { %1236 = vmax.xlane.f32.xlu0 %v1219_v6 }
 0x369   : > { %1248 = vmax.xlane.f32.xlu1 %v2632_v8 }
 0x36a   : > { %1246 = vmax.xlane.f32.xlu0 %v1224_v9 }
 0x36d   : > { %1244 = vmax.xlane.f32.xlu1 %v2639_v7 }
 0x36e   : > { %1242 = vmax.xlane.f32.xlu0 %v2643_v12 }
 0x371   : > { %1260 = vmax.xlane.f32.xlu1 %v2649_v15 }
 0x372   : > { %1258 = vmax.xlane.f32.xlu0 %v2653_v16 }
 0x375   : > { %1264 = vmax.xlane.f32.xlu1 %v2659_v20 }
 0x376   : > { %1262 = vmax.xlane.f32.xlu0 %v2663_v21 }
 0x3e6   : > { %v1239_v23 = vpop.xlane.xlu1 %1238 }
 0x3e7   : > { %v1255_v22 = vpop.xlane.xlu0 %1254  ;;  %v1268_v26 = vsub.f32 %v1220_v50, %v1239_v23 }
 0x3e8   : > { %v1276_v19 = vsub.f32 %v1228_v49, %v1255_v22 }
 0x3e9   : > { %v1286_v25 = vmul.f32 1.442695, %v1268_v26 }
 0x3ea   : > { %v1241_v24 = vpop.xlane.xlu1 %1240  ;;  %v1302_v29 = vmul.f32 1.442695, %v1276_v19 }
 0x3eb   : > { %v1235_v27 = vpop.xlane.xlu0 %1234  ;;  %v1269_v28 = vsub.f32 %v1221_v53, %v1241_v24  ;;  %1973 = vpow2.f32 %v1286_v25 }
 0x3ec   : > { %v1266_v30 = vsub.f32 %v2619_v54, %v1235_v27 }
 0x3ed   : > { %v1288_v31 = vmul.f32 1.442695, %v1269_v28 }
 0x3ee   : > { %v1257_v32 = vpop.xlane.xlu1 %1256  ;;  %v1282_v36 = vmul.f32 1.442695, %v1266_v30 }
 0x3ef   : > { %v1251_v33 = vpop.xlane.xlu0 %1250  ;;  %1975 = vpow2.f32 %v1288_v31  ;;  %v1277_v34 = vsub.f32 %v1229_v63, %v1257_v32 }
 0x3f0   : > { %v1274_v35 = vsub.f32 %v1226_v0, %v1251_v33  ;;  %1977 = vpow2.f32 %v1302_v29 }
 0x3f1   : > { %v1304_v37 = vmul.f32 1.442695, %v1277_v34 }
 0x3f2   : > { %v1253_v38 = vpop.xlane.xlu1 %1252  ;;  %v1298_v40 = vmul.f32 1.442695, %v1274_v35 }
 0x3f3   : > { %v1237_v39 = vpop.xlane.xlu0 %1236  ;;  %1979 = vpow2.f32 %v1304_v37  ;;  %v1275_v41 = vsub.f32 %v1227_v5, %v1253_v38 }
 0x3f4   : > { %v1267_v42 = vsub.f32 %v1219_v6, %v1237_v39  ;;  %1981 = vpow2.f32 %v1282_v36 }
 0x3f5   : > { %v2668_v44 = vpop.eup %1973  ;;  %1983 = vpow2.f32 %v1298_v40  ;;  %v1300_v47 = vmul.f32 1.442695, %v1275_v41 }
 0x3f6   : > { %v1284_v43 = vmul.f32 1.442695, %v1267_v42  ;;  %v1249_v45 = vpop.xlane.xlu1 %1248  ;;  %1318 = vadd.xlane.f32.xlu0 %v2668_v44 }
 0x3f7   : > { %v1247_v46 = vpop.xlane.xlu0 %1246  ;;  %v1273_v48 = vsub.f32 %v2632_v8, %v1249_v45 }
 0x3f8   : > { %v1272_v49 = vsub.f32 %v1224_v9, %v1247_v46  ;;  %1985 = vpow2.f32 %v1284_v43 }
 0x3f9   : > { %v2672_v50 = vpop.eup %1975  ;;  %1987 = vpow2.f32 %v1300_v47  ;;  %v1296_v55 = vmul.f32 1.442695, %v1273_v48 }
 0x3fa   : > { %v1294_v51 = vmul.f32 1.442695, %v1272_v49  ;;  %v2674_v52 = vpop.eup %1977  ;;  %1320 = vadd.xlane.f32.xlu1 %v2672_v50  ;;  %v1245_v53 = vpop.xlane.xlu1 %1244 }
 0x3fb   : > { %v1243_v54 = vpop.xlane.xlu0 %1242  ;;  %v1271_v56 = vsub.f32 %v2639_v7, %v1245_v53  ;;  %1334 = vadd.xlane.f32.xlu0 %v2674_v52 }
 0x3fc   : > { %v1270_v57 = vsub.f32 %v2643_v12, %v1243_v54  ;;  %1989 = vpow2.f32 %v1294_v51 }
 0x3fd   : > { %v2680_v58 = vpop.eup %1979  ;;  %1991 = vpow2.f32 %v1296_v55  ;;  %v1292_v63 = vmul.f32 1.442695, %v1271_v56 }
 0x3fe   : > { %v1290_v59 = vmul.f32 1.442695, %v1270_v57  ;;  %v2682_v60 = vpop.eup %1981  ;;  %1336 = vadd.xlane.f32.xlu1 %v2680_v58  ;;  %v1261_v61 = vpop.xlane.xlu1 %1260 }
 0x3ff   : > { %v1259_v62 = vpop.xlane.xlu0 %1258  ;;  %v1279_v0 = vsub.f32 %v2649_v15, %v1261_v61  ;;  %1314 = vadd.xlane.f32.xlu0 %v2682_v60  ;;  %v2688_v2 = vpop.eup %1983 }
 0x400   : > { %v1278_v1 = vsub.f32 %v2653_v16, %v1259_v62  ;;  %1993 = vpow2.f32 %v1290_v59 }
 0x401   : > { %1995 = vpow2.f32 %v1292_v63  ;;  %v1308_v8 = vmul.f32 1.442695, %v1279_v0 }
 0x402   : > { %v1306_v3 = vmul.f32 1.442695, %v1278_v1  ;;  %v2690_v4 = vpop.eup %1985  ;;  %v1265_v5 = vpop.xlane.xlu1 %1264 }
 0x403   : > { %v1263_v6 = vpop.xlane.xlu0 %1262  ;;  %1330 = vadd.xlane.f32.xlu0 %v2688_v2  ;;  %1316 = vadd.xlane.f32.xlu1 %v2690_v4  ;;  %v1281_v10 = vsub.f32 %v2659_v20, %v1265_v5  ;;  %v2696_v11 = vpop.eup %1987 }
 0x404   : > { %v1280_v9 = vsub.f32 %v2663_v21, %v1263_v6  ;;  %1997 = vpow2.f32 %v1306_v3 }
 0x405   : > { %1999 = vpow2.f32 %v1308_v8  ;;  %v1312_v7 = vmul.f32 1.442695, %v1281_v10 }
 0x406   : > { %v1310_v13 = vmul.f32 1.442695, %v1280_v9  ;;  %v2698_v14 = vpop.eup %1989 }
 0x407   : > { %1332 = vadd.xlane.f32.xlu1 %v2696_v11  ;;  %1326 = vadd.xlane.f32.xlu0 %v2698_v14  ;;  %v2702_v12 = vpop.eup %1991 }
 0x408   : > { %2001 = vpow2.f32 %v1310_v13 }
 0x409   : > { %2003 = vpow2.f32 %v1312_v7 }
 0x40a   : > { %v2704_v15 = vpop.eup %1993 }
 0x40b   : > { %1328 = vadd.xlane.f32.xlu1 %v2702_v12  ;;  %1322 = vadd.xlane.f32.xlu0 %v2704_v15  ;;  %v2708_v16 = vpop.eup %1995 }
 0x40e   : > { %v2710_v17 = vpop.eup %1997 }
 0x40f   : > { %1324 = vadd.xlane.f32.xlu1 %v2708_v16  ;;  %1338 = vadd.xlane.f32.xlu0 %v2710_v17  ;;  %v2714_v18 = vpop.eup %1999 }
 0x412   : > { %v2716_v20 = vpop.eup %2001 }
 0x413   : > { %1340 = vadd.xlane.f32.xlu1 %v2714_v18  ;;  %1342 = vadd.xlane.f32.xlu0 %v2716_v20  ;;  %v2720_v21 = vpop.eup %2003 }
 0x417   : > { %1344 = vadd.xlane.f32.xlu1 %v2720_v21 }
 0x483   : > { %v1319_v22 = vpop.xlane.xlu0 %1318 }
 0x484   : > { %2005 = vrcp.f32 %v1319_v22 }
 0x487   : > { %v1321_v23 = vpop.xlane.xlu1 %1320 }
 0x488   : > { %2007 = vrcp.f32 %v1321_v23  ;;  %v1335_v26 = vpop.xlane.xlu0 %1334 }
 0x489   : > { %2009 = vrcp.f32 %v1335_v26 }
 0x48b   : > { %v1337_v19 = vpop.xlane.xlu1 %1336 }
 0x48c   : > { %2011 = vrcp.f32 %v1337_v19  ;;  %v1315_v25 = vpop.xlane.xlu0 %1314 }
 0x48d   : > { %2013 = vrcp.f32 %v1315_v25 }
 0x48e   : > { %v2006_v24 = vpop.eup %2005 }
 0x48f   : > { %v1351_v27 = vmul.f32 %v2006_v24, %v2668_v44 }
 0x490   : > { %v1317_v28 = vpop.xlane.xlu1 %1316  ;;  %v1331_v29 = vpop.xlane.xlu0 %1330 }
 0x491   : > { %2015 = vrcp.f32 %v1317_v28  ;;  %1380 = vst [vmem:[#allocation4 + $0x10] sm:$0xff] %v1351_v27 }
 0x492   : > { %v2008_v30 = vpop.eup %2007  ;;  %2017 = vrcp.f32 %v1331_v29 }
 0x493   : > { %v2010_v31 = vpop.eup %2009  ;;  %v1353_v32 = vmul.f32 %v2008_v30, %v2672_v50 }
 0x494   : > { %v1367_v33 = vmul.f32 %v2010_v31, %v2674_v52  ;;  %v1333_v34 = vpop.xlane.xlu1 %1332  ;;  %v1327_v35 = vpop.xlane.xlu0 %1326 }
 0x495   : > { %1381 = vst [vmem:[#allocation4 + $0x18] sm:$0xff] %v1353_v32  ;;  %2019 = vrcp.f32 %v1333_v34 }
 0x496   : > { %v2012_v36 = vpop.eup %2011  ;;  %1388 = vst [vmem:[#allocation4 + $0x50] sm:$0xff] %v1367_v33  ;;  %2021 = vrcp.f32 %v1327_v35 }
 0x497   : > { %v2014_v37 = vpop.eup %2013  ;;  %v1369_v38 = vmul.f32 %v2012_v36, %v2680_v58 }
 0x498   : > { %v1347_v39 = vmul.f32 %v2014_v37, %v2682_v60  ;;  %v1329_v40 = vpop.xlane.xlu1 %1328  ;;  %v1323_v41 = vpop.xlane.xlu0 %1322 }
 0x499   : > { %1389 = vst [vmem:[#allocation4 + $0x58] sm:$0xff] %v1369_v38  ;;  %2023 = vrcp.f32 %v1329_v40 }
 0x49a   : > { %1378 = vst [vmem:[#allocation4] sm:$0xff] %v1347_v39  ;;  %2025 = vrcp.f32 %v1323_v41 }
 0x49b   : > { %v2016_v42 = vpop.eup %2015 }
 0x49c   : > { %v2018_v43 = vpop.eup %2017  ;;  %v1349_v44 = vmul.f32 %v2016_v42, %v2690_v4  ;;  %v1325_v45 = vpop.xlane.xlu1 %1324 }
 0x49d   : > { %v1339_v46 = vpop.xlane.xlu0 %1338  ;;  %v1363_v47 = vmul.f32 %v2018_v43, %v2688_v2  ;;  %2027 = vrcp.f32 %v1325_v45 }
 0x49e   : > { %1379 = vst [vmem:[#allocation4 + $0x8] sm:$0xff] %v1349_v44  ;;  %2029 = vrcp.f32 %v1339_v46 }
 0x49f   : > { %v2020_v48 = vpop.eup %2019  ;;  %1386 = vst [vmem:[#allocation4 + $0x40] sm:$0xff] %v1363_v47 }
 0x4a0   : > { %v2022_v49 = vpop.eup %2021  ;;  %v1365_v50 = vmul.f32 %v2020_v48, %v2696_v11  ;;  %v1341_v51 = vpop.xlane.xlu1 %1340 }
 0x4a1   : > { %v1343_v52 = vpop.xlane.xlu0 %1342  ;;  %v1359_v53 = vmul.f32 %v2022_v49, %v2698_v14  ;;  %2031 = vrcp.f32 %v1341_v51 }
 0x4a2   : > { %1387 = vst [vmem:[#allocation4 + $0x48] sm:$0xff] %v1365_v50  ;;  %2033 = vrcp.f32 %v1343_v52 }
 0x4a3   : > { %v2024_v54 = vpop.eup %2023  ;;  %1384 = vst [vmem:[#allocation4 + $0x30] sm:$0xff] %v1359_v53 }
 0x4a4   : > { %v2026_v55 = vpop.eup %2025  ;;  %v1361_v56 = vmul.f32 %v2024_v54, %v2702_v12  ;;  %v1345_v57 = vpop.xlane.xlu1 %1344 }
 0x4a5   : > { %v1355_v58 = vmul.f32 %v2026_v55, %v2704_v15  ;;  %2035 = vrcp.f32 %v1345_v57 }
 0x4a6   : > { %1385 = vst [vmem:[#allocation4 + $0x38] sm:$0xff] %v1361_v56 }
 0x4a7   : > { %v2028_v59 = vpop.eup %2027  ;;  %1382 = vst [vmem:[#allocation4 + $0x20] sm:$0xff] %v1355_v58 }
 0x4a8   : > { %v2030_v60 = vpop.eup %2029  ;;  %v1357_v61 = vmul.f32 %v2028_v59, %v2708_v16 }
 0x4a9   : > { %v1371_v62 = vmul.f32 %v2030_v60, %v2710_v17 }
 0x4aa   : > { %1383 = vst [vmem:[#allocation4 + $0x28] sm:$0xff] %v1357_v61 }
 0x4ab   : > { %v2032_v63 = vpop.eup %2031  ;;  %1390 = vst [vmem:[#allocation4 + $0x60] sm:$0xff] %v1371_v62 }
 0x4ac   : > { %v2034_v0 = vpop.eup %2033  ;;  %v1373_v1 = vmul.f32 %v2032_v63, %v2714_v18 }
 0x4ad   : > { %v1375_v2 = vmul.f32 %v2034_v0, %v2716_v20 }
 0x4ae   : > { %1391 = vst [vmem:[#allocation4 + $0x68] sm:$0xff] %v1373_v1 }
 0x4af   : > { %v2036_v3 = vpop.eup %2035  ;;  %1392 = vst [vmem:[#allocation4 + $0x70] sm:$0xff] %v1375_v2 }
 0x4b0   : > { %v1377_v4 = vmul.f32 %v2036_v3, %v2720_v21 }
 0x4b2   : > { %1393 = vst [vmem:[#allocation4 + $0x78] sm:$0xff] %v1377_v4 }
 0x4b3   : > { %2106 = shalt.err (!%p2103_p0)  }
 0x4b4   : > { %s2107_s12 = scalar_lea.hbm %s2776_s7, 2048 }
 0x4b5   : > { %p2108_p10 = scmp.ne.s32.totalorder %s2776_s7, %s2107_s12  ;;  %p2111_p12 = scmp.lt.u32.totalorder %s2107_s12, %s2776_s7 }
 0x4b7   : > { %p2113_p3 = pnand %p2111_p12, %p2108_p10 }
 0x4b9   : > { %2116 = shalt.err (!%p2113_p3)  }
 0x4ba   : > { %1407 = dma.vmem_to_hbm [thread:$0]  %s1405_s23, 2048, %s2776_s7, [#allocation5 + $0x2] }
 0x4bb   : > { %2155 = dma.done.wait [#allocation5 + $0x2], 2048 }
 0x4bc   : > { %2156 = vsyncadd [#allocation5 + $0x2], 4294965248 }
 0x4bd PF: > { %s21_s29 = sadd.s32 1, %s2179_s29   ;;  %s2788_s24 = smov %s2163_s25 }
 0x4be   : > { %p18_p5 = scmp.ge.s32.totalorder %s21_s29, 3   ;;  %s2789_s25 = smov %s2167_s26 }
 0x4bf   : > { %s2790_s26 = smov %s2307_s18  ;;  %s2791_s27 = smov %s2175_s28 }
 0x4c0   : > { %s2792_s28 = smov %s2794_s30  ;;  %20 = sbr.rel (!%p18_p5) target bundleno = 5 (0x5), region = 189 }
 0x4c7   :  { %1411 = vsyncpa [#allocation7], 1 }
 0x4c8   :  { %1413 = vsyncpa [#allocation7 + $0x1], 1 }
 0x4c9   :  { %1414 = vsyncpa [#allocation9], 1 }
 0x4ca   :  { %1415 = vsyncmov [#allocation5] }
 0x4cd   :  { %s1416_s21 = vpop.sfrf %1415 }
 0x4ce   :  { %p1596_p1 = scmp.ne.s32.totalorder %s1416_s21, 0 }
 0x4d0   :  { %1420 = shalt.err (%p1596_p1)  }
 0x4d1   :  { %1422 = vsyncmov [#allocation5 + $0x1] }
 0x4d4   :  { %s1423_s17 = vpop.sfrf %1422 }
 0x4d5   :  { %p1597_p2 = scmp.ne.s32.totalorder %s1423_s17, 0 }
 0x4d7   :  { %1427 = shalt.err (%p1597_p2)  }
 0x4d8   :  { %1429 = vsyncmov [#allocation5 + $0x2] }
 0x4db   :  { %s1430_s18 = vpop.sfrf %1429 }
 0x4dc   :  { %p1598_p4 = scmp.ne.s32.totalorder %s1430_s18, 0 }
 0x4de   :  { %1434 = shalt.err (%p1598_p4)  }

</bundles_post_ra>
